<compile_context>
chip_gen: v6e
topology: v6e:2x2x1
jax: 0.10.0
libtpu: 0.0.40
codegen_flags: <defaults>
</compile_context>

<pallas_src>
import functools

import jax
import jax.numpy as jnp
from jax import lax
from jax.experimental import pallas as pl
from jax.experimental.pallas import tpu as pltpu


def latent_attention_kernel(
    x_ref,      # (TB, N, D)    f32
    vec_ref,    # (8, D)        f32   rows: ln1_g, ln1_b, ln2_g, ln2_b, bo, b1, b2, pad
    wqkv_ref,   # (D, 3*inner)  bf16  columns head-major, [q|k|v] per head, scale in q cols
    wo_ref,     # (inner, D)    bf16  flat to_out weight (head-major rows)
    w1_ref,     # (D, D)        bf16
    w2_ref,     # (D, D)        bf16
    o_ref,      # (TB, N, D)    f32
    *, heads, dim_head, eps,
):
    f32, bf16 = jnp.float32, jnp.bfloat16
    TB, N, D = x_ref.shape
    dh = dim_head
    inner = heads * dh
    M = TB * N

    x = x_ref[...].reshape(M, D)                      # flatten the batch block (free reshape)

    vecs = vec_ref[...]
    ln1_g, ln1_b = vecs[0:1, :], vecs[1:2, :]
    ln2_g, ln2_b = vecs[2:3, :], vecs[3:4, :]
    bo, b1, b2 = vecs[4:5, :], vecs[5:6, :], vecs[6:7, :]

    def layernorm(v, g, b):
        mu = jnp.mean(v, axis=-1, keepdims=True)
        var = jnp.mean((v - mu) ** 2, axis=-1, keepdims=True)
        return (v - mu) * lax.rsqrt(var + eps) * g + b

    # ------------------ attention: to_out(softmax(q k^T) v) + x -------------------
    xn = layernorm(x, ln1_g, ln1_b).astype(bf16)      # (M, D) bf16 operand, f32 math above

    # ONE lane-dense projection for q|k|v over all heads (K = D, output width 3*inner).
    qkv = jnp.dot(xn, wqkv_ref[...], preferred_element_type=f32)        # (M, 3*inner) f32

    # Per-head repartition: static lane slices + leading-dim concat (no matmuls, no
    # broadcast_to of xn).  Resulting batch index is b = head*TB + batch_element.
    qkv_h = jnp.concatenate(
        [qkv[:, h * 3 * dh:(h + 1) * 3 * dh].reshape(TB, N, 3 * dh)
         for h in range(heads)],
        axis=0)                                                          # (H*TB, N, 3*dh)
    q = qkv_h[..., 0:dh].astype(bf16)                 # softmax scale already folded in weight
    k = qkv_h[..., dh:2 * dh].astype(bf16)
    v = qkv_h[..., 2 * dh:3 * dh].astype(bf16)

    # Batched per (head, batch element); tokens never attend across batch elements.
    sim = jnp.einsum('bik,bjk->bij', q, k, preferred_element_type=f32)   # (H*TB, N, N) f32
    sim = sim - jnp.max(sim, axis=-1, keepdims=True)
    p = jnp.exp(sim)
    attn = p / jnp.sum(p, axis=-1, keepdims=True)     # exact denominator (parity concern)
    ov = jnp.einsum('bij,bjk->bik', attn.astype(bf16), v,
                    preferred_element_type=f32)                          # (H*TB, N, dh) f32

    # Fused "per-head projection + head-sum": repack ov lane-dense as (M, H*dh) and hit Wo
    # once (K = H*dh, output lane dim = D) instead of H tiny matmuls + an H-way VPU sum.
    ov_cat = jnp.concatenate([ov[h * TB:(h + 1) * TB] for h in range(heads)],
                             axis=-1)                  # (TB, N, inner), lane index = h*dh + d
    ovf = ov_cat.reshape(M, inner).astype(bf16)
    attn_out = jnp.dot(ovf, wo_ref[...], preferred_element_type=f32) + bo   # (M, D)
    h_attn = attn_out + x                              # residual (original x)

    # ------------------ feed-forward: W2 relu(W1 LN2(h) + b1) + b2 + x ------------
    xn2 = layernorm(h_attn, ln2_g, ln2_b).astype(bf16)
    hidden = jnp.maximum(
        jnp.dot(xn2, w1_ref[...], preferred_element_type=f32) + b1, 0.0)
    ff = jnp.dot(hidden.astype(bf16), w2_ref[...], preferred_element_type=f32) + b2

    # NOTE: the PyTorch forward adds the ORIGINAL latents here (not h_attn).
    o_ref[...] = (ff + x).reshape(TB, N, D).astype(o_ref.dtype)


def latent_attention(x, params, *, heads, dim_head, block_b=None):
    (ln1g, ln1b, ln2g, ln2b, wq, wkv, wo, bo, w1, b1, w2, b2) = params
    B, N, D = x.shape
    dh = dim_head
    inner = heads * dh
    scale = dh ** -0.5

    # Pack the seven (1, D) vectors into one (8, D) tensor -> a single small DMA per step.
    vecs = jnp.concatenate(
        [ln1g, ln1b, ln2g, ln2b, bo, b1, b2, jnp.zeros((1, D), jnp.float32)], axis=0)

    # Combined QKV weight: columns head-major, [q_h | k_h | v_h] per head; softmax scale is
    # folded into the q columns (free, trace time).  bf16 operands, f32 MXU accumulation.
    wq_h = (wq * scale).reshape(D, heads, dh)
    wk_h = wkv[:, :inner].reshape(D, heads, dh)
    wv_h = wkv[:, inner:].reshape(D, heads, dh)
    wqkv = jnp.concatenate([wq_h, wk_h, wv_h], axis=-1).reshape(D, 3 * inner)
    wqkv = wqkv.astype(jnp.bfloat16)
    wo_b = wo.astype(jnp.bfloat16)        # (inner, D): used flat -> fused head-sum in-kernel
    w1_b = w1.astype(jnp.bfloat16)
    w2_b = w2.astype(jnp.bfloat16)

    # Batch-block size: fill the MXU M dimension (~256 rows) but keep >= 2 grid steps when
    # possible so both of v7x's TensorCores get work; must divide B.
    if block_b is None:
        block_b = max(1, min(B, 256 // max(N, 1)))
        if block_b == B and B > 1:
            block_b = B // 2
    while B % block_b:
        block_b -= 1
    tb = block_b

    kernel = functools.partial(latent_attention_kernel,
                               heads=heads, dim_head=dh, eps=1e-5)

    def build(single_buffer_weights):
        def const(shape):
            nd = len(shape)
            idx = lambda b, _nd=nd: (0,) * _nd
            if single_buffer_weights:
                # Fetched once (constant index map); double buffering would only double
                # their VMEM residency (matters most on v7x's 64 MiB/TC).
                return pl.BlockSpec(shape, idx, pipeline_mode=pl.Buffered(1))
            return pl.BlockSpec(shape, idx)

        return pl.pallas_call(
            kernel,
            out_shape=jax.ShapeDtypeStruct((B, N, D), x.dtype),
            grid=(B // tb,),
            in_specs=[
                pl.BlockSpec((tb, N, D), lambda b: (b, 0, 0)),   # x (TB batch rows per step)
                const((8, D)),                                    # packed LN/bias vectors
                const((D, 3 * inner)),                            # Wqkv (bf16, scale folded)
                const((inner, D)),                                # Wo   (bf16, flat)
                const((D, D)),                                    # FF W1 (bf16)
                const((D, D)),                                    # FF W2 (bf16)
            ],
            out_specs=pl.BlockSpec((tb, N, D), lambda b: (b, 0, 0)),
            compiler_params=pltpu.CompilerParams(
                dimension_semantics=("parallel",),
                # Explicit VMEM budget: fits v7x's 64 MiB/TC with headroom and lifts the
                # 32 MiB scoped default on v5e/v6e for larger batch tiles.
                vmem_limit_bytes=48 * 1024 * 1024,
            ),
        )

    args = (x, vecs, wqkv, wo_b, w1_b, w2_b)
    try:
        return jax.block_until_ready(build(True)(*args))
    except Exception:
        # pipeline_mode / Buffered(1) unsupported by this build -> default double buffering.
        return build(False)(*args)


def reference(x, params, *, heads, dim_head):
    # Pure-JAX f32 reference mirroring the PyTorch forward exactly
    # (both residuals add the ORIGINAL latents, per the module's forward).
    (ln1g, ln1b, ln2g, ln2b, wq, wkv, wo, bo, w1, b1, w2, b2) = params
    eps = 1e-5
    inner = heads * dim_head
    B, N, D = x.shape

    def ln(v, g, b):
        mu = v.mean(-1, keepdims=True)
        var = ((v - mu) ** 2).mean(-1, keepdims=True)
        return (v - mu) / jnp.sqrt(var + eps) * g + b

    xn = ln(x, ln1g, ln1b)
    q = xn @ wq
    kv = xn @ wkv
    k, v = kv[..., :inner], kv[..., inner:]
    qh = q.reshape(B, N, heads, dim_head).transpose(0, 2, 1, 3)
    kh = k.reshape(B, N, heads, dim_head).transpose(0, 2, 1, 3)
    vh = v.reshape(B, N, heads, dim_head).transpose(0, 2, 1, 3)
    sim = jnp.einsum("bhid,bhjd->bhij", qh, kh) * dim_head ** -0.5
    attn = jax.nn.softmax(sim, axis=-1)
    out = jnp.einsum("bhij,bhjd->bhid", attn, vh).transpose(0, 2, 1, 3).reshape(B, N, inner)
    h_attn = out @ wo + bo + x
    xn2 = ln(h_attn, ln2g, ln2b)
    ff = jnp.maximum(xn2 @ w1 + b1, 0.0) @ w2 + b2
    return ff + x


def init_params(key, D, heads, dim_head):
    inner = heads * dim_head
    ks = jax.random.split(key, 8)
    s = 0.1
    return (
        jnp.ones((1, D), jnp.float32),                               # norm_attn gamma
        jnp.zeros((1, D), jnp.float32),                              # norm_attn beta
        jnp.ones((1, D), jnp.float32),                               # norm_ff gamma
        jnp.zeros((1, D), jnp.float32),                              # norm_ff beta
        s * jax.random.normal(ks[0], (D, inner), jnp.float32),       # Wq  (to_q, no bias)
        s * jax.random.normal(ks[1], (D, 2 * inner), jnp.float32),   # Wkv (to_kv, no bias)
        s * jax.random.normal(ks[2], (inner, D), jnp.float32),       # Wo  (to_out weight)
        s * jax.random.normal(ks[3], (1, D), jnp.float32),           # bo  (to_out bias)
        s * jax.random.normal(ks[4], (D, D), jnp.float32),           # FF W1 (mult=1)
        s * jax.random.normal(ks[5], (1, D), jnp.float32),           # FF b1
        s * jax.random.normal(ks[6], (D, D), jnp.float32),           # FF W2
        s * jax.random.normal(ks[7], (1, D), jnp.float32),           # FF b2
    )


if __name__ == "__main__":
    # Small shapes: B=4 so the default blocking picks TB=2 with a 2-step "parallel" grid
    # (exercises both the batch flattening and the multi-step grid paths).
    B, N, D = 4, 8, 32        # batch, latent tokens, query_dim
    heads, dim_head = 2, 8    # small head config (dropout = 0.0 -> identity, omitted)

    key = jax.random.PRNGKey(0)
    kx, kp = jax.random.split(key)
    x = jax.random.normal(kx, (B, N, D), jnp.float32)
    params = init_params(kp, D, heads, dim_head)

    out = latent_attention(x, params, heads=heads, dim_head=dim_head)
    out = jax.block_until_ready(out)

    ref = reference(x, params, heads=heads, dim_head=dim_head)
    assert out.shape == (B, N, D)
    # bf16 MXU operands (f32 accumulation) vs the f32 reference -> loosened tolerance.
    err = float(jnp.max(jnp.abs(out - ref)))
    assert jnp.allclose(out, ref, rtol=2e-2, atol=2e-2), f"mismatch vs reference, max|diff|={err}"

    print("KERNEL_OK")
</pallas_src>

<mosaic_0001>
module attributes {stable_mosaic.version = 11 : i64} {
  func.func @latent_attention_kernel(%arg0: i32, %arg1: memref<2x8x32xf32, #tpu.memory_space<vmem>>, %arg2: memref<8x32xf32, #tpu.memory_space<vmem>>, %arg3: memref<32x48xbf16, #tpu.memory_space<vmem>>, %arg4: memref<16x32xbf16, #tpu.memory_space<vmem>>, %arg5: memref<32x32xbf16, #tpu.memory_space<vmem>>, %arg6: memref<32x32xbf16, #tpu.memory_space<vmem>>, %arg7: memref<2x8x32xf32, #tpu.memory_space<vmem>>) attributes {dimension_semantics = [#tpu.dimension_semantics<parallel>], iteration_bounds = array<i64: 2>, scalar_prefetch = 0 : i64, scratch_operands = 0 : i64, tpu.core_type = #tpu.core_type<tc>, window_params = [{transform_indices = @transform_0, window_bounds = array<i64: 2, 8, 32>}, {pipeline_mode = #tpu.pipeline_mode<synchronous>, transform_indices = @transform_1, window_bounds = array<i64: 8, 32>}, {pipeline_mode = #tpu.pipeline_mode<synchronous>, transform_indices = @transform_2, window_bounds = array<i64: 32, 48>}, {pipeline_mode = #tpu.pipeline_mode<synchronous>, transform_indices = @transform_3, window_bounds = array<i64: 16, 32>}, {pipeline_mode = #tpu.pipeline_mode<synchronous>, transform_indices = @transform_4, window_bounds = array<i64: 32, 32>}, {pipeline_mode = #tpu.pipeline_mode<synchronous>, transform_indices = @transform_5, window_bounds = array<i64: 32, 32>}, {transform_indices = @transform_6, window_bounds = array<i64: 2, 8, 32>}]} {
    %c0 = arith.constant 0 : index
    %c0_0 = arith.constant 0 : index
    %c0_1 = arith.constant 0 : index
    %0 = vector.load %arg1[%c0, %c0_0, %c0_1] : memref<2x8x32xf32, #tpu.memory_space<vmem>>, vector<2x8x32xf32>
    %1 = vector.shape_cast %0 : vector<2x8x32xf32> to vector<16x32xf32>
    %c0_2 = arith.constant 0 : index
    %c0_3 = arith.constant 0 : index
    %2 = vector.load %arg2[%c0_2, %c0_3] : memref<8x32xf32, #tpu.memory_space<vmem>>, vector<8x32xf32>
    %3 = vector.extract_strided_slice %2 {offsets = [0, 0], sizes = [1, 32], strides = [1, 1]} : vector<8x32xf32> to vector<1x32xf32>
    %4 = vector.extract_strided_slice %2 {offsets = [1, 0], sizes = [1, 32], strides = [1, 1]} : vector<8x32xf32> to vector<1x32xf32>
    %5 = vector.extract_strided_slice %2 {offsets = [2, 0], sizes = [1, 32], strides = [1, 1]} : vector<8x32xf32> to vector<1x32xf32>
    %6 = vector.extract_strided_slice %2 {offsets = [3, 0], sizes = [1, 32], strides = [1, 1]} : vector<8x32xf32> to vector<1x32xf32>
    %7 = vector.extract_strided_slice %2 {offsets = [4, 0], sizes = [1, 32], strides = [1, 1]} : vector<8x32xf32> to vector<1x32xf32>
    %8 = vector.extract_strided_slice %2 {offsets = [5, 0], sizes = [1, 32], strides = [1, 1]} : vector<8x32xf32> to vector<1x32xf32>
    %9 = vector.extract_strided_slice %2 {offsets = [6, 0], sizes = [1, 32], strides = [1, 1]} : vector<8x32xf32> to vector<1x32xf32>
    %cst = arith.constant dense<0.000000e+00> : vector<16xf32>
    %10 = vector.multi_reduction <add>, %1, %cst [1] : vector<16x32xf32> to vector<16xf32>
    %11 = vector.shape_cast %10 : vector<16xf32> to vector<16x1xf32>
    %cst_4 = arith.constant 3.200000e+01 : f32
    %12 = vector.broadcast %cst_4 : f32 to vector<16x1xf32>
    %13 = arith.divf %11, %12 : vector<16x1xf32>
    %14 = vector.broadcast %13 : vector<16x1xf32> to vector<16x32xf32>
    %15 = arith.subf %1, %14 : vector<16x32xf32>
    %16 = arith.mulf %15, %15 : vector<16x32xf32>
    %cst_5 = arith.constant dense<0.000000e+00> : vector<16xf32>
    %17 = vector.multi_reduction <add>, %16, %cst_5 [1] : vector<16x32xf32> to vector<16xf32>
    %18 = vector.shape_cast %17 : vector<16xf32> to vector<16x1xf32>
    %cst_6 = arith.constant 3.200000e+01 : f32
    %19 = vector.broadcast %cst_6 : f32 to vector<16x1xf32>
    %20 = arith.divf %18, %19 : vector<16x1xf32>
    %21 = vector.broadcast %13 : vector<16x1xf32> to vector<16x32xf32>
    %22 = arith.subf %1, %21 : vector<16x32xf32>
    %cst_7 = arith.constant 9.99999974E-6 : f32
    %23 = vector.broadcast %cst_7 : f32 to vector<16x1xf32>
    %24 = arith.addf %20, %23 : vector<16x1xf32>
    %25 = math.rsqrt %24 : vector<16x1xf32>
    %26 = vector.broadcast %25 : vector<16x1xf32> to vector<16x32xf32>
    %27 = arith.mulf %22, %26 : vector<16x32xf32>
    %28 = vector.broadcast %3 : vector<1x32xf32> to vector<16x32xf32>
    %29 = arith.mulf %27, %28 : vector<16x32xf32>
    %30 = vector.broadcast %4 : vector<1x32xf32> to vector<16x32xf32>
    %31 = arith.addf %29, %30 : vector<16x32xf32>
    %32 = arith.truncf %31 : vector<16x32xf32> to vector<16x32xbf16>
    %c0_8 = arith.constant 0 : index
    %c0_9 = arith.constant 0 : index
    %33 = vector.load %arg3[%c0_8, %c0_9] : memref<32x48xbf16, #tpu.memory_space<vmem>>, vector<32x48xbf16>
    %cst_10 = arith.constant dense<0.000000e+00> : vector<16x48xf32>
    %34 = tpu.matmul %32, %33, %cst_10 {dimension_numbers = #tpu.dot_dimension_numbers<[1], [0], [0], [1], [0, 0, 1, 1], [], []>} : vector<16x32xbf16>, vector<32x48xbf16>, vector<16x48xf32> -> vector<16x48xf32>
    %35 = vector.extract_strided_slice %34 {offsets = [0, 0], sizes = [16, 24], strides = [1, 1]} : vector<16x48xf32> to vector<16x24xf32>
    %36 = vector.shape_cast %35 : vector<16x24xf32> to vector<2x8x24xf32>
    %37 = vector.extract_strided_slice %34 {offsets = [0, 24], sizes = [16, 24], strides = [1, 1]} : vector<16x48xf32> to vector<16x24xf32>
    %38 = vector.shape_cast %37 : vector<16x24xf32> to vector<2x8x24xf32>
    %39 = tpu.concatenate %36, %38 in 0 : vector<2x8x24xf32>, vector<2x8x24xf32> -> vector<4x8x24xf32>
    %40 = vector.extract_strided_slice %39 {offsets = [0, 0, 0], sizes = [4, 8, 8], strides = [1, 1, 1]} : vector<4x8x24xf32> to vector<4x8x8xf32>
    %41 = arith.truncf %40 : vector<4x8x8xf32> to vector<4x8x8xbf16>
    %42 = vector.extract_strided_slice %39 {offsets = [0, 0, 8], sizes = [4, 8, 8], strides = [1, 1, 1]} : vector<4x8x24xf32> to vector<4x8x8xf32>
    %43 = arith.truncf %42 : vector<4x8x8xf32> to vector<4x8x8xbf16>
    %44 = vector.extract_strided_slice %39 {offsets = [0, 0, 16], sizes = [4, 8, 8], strides = [1, 1, 1]} : vector<4x8x24xf32> to vector<4x8x8xf32>
    %45 = arith.truncf %44 : vector<4x8x8xf32> to vector<4x8x8xbf16>
    "tpu.trace_start"() <{level = 10 : i32, message = "bik,bjk->bij"}> : () -> ()
    %cst_11 = arith.constant dense<0.000000e+00> : vector<4x8x8xf32>
    %46 = tpu.matmul %41, %43, %cst_11 {dimension_numbers = #tpu.dot_dimension_numbers<[2], [2], [1], [1], [0, 0, 0, 1, 1, 1], [0], [0]>} : vector<4x8x8xbf16>, vector<4x8x8xbf16>, vector<4x8x8xf32> -> vector<4x8x8xf32>
    "tpu.trace_stop"() : () -> ()
    %cst_12 = arith.constant dense<0xFF800000> : vector<4x8xf32>
    %47 = vector.multi_reduction <maximumf>, %46, %cst_12 [2] : vector<4x8x8xf32> to vector<4x8xf32>
    %48 = vector.shape_cast %47 : vector<4x8xf32> to vector<4x8x1xf32>
    %49 = vector.broadcast %48 : vector<4x8x1xf32> to vector<4x8x8xf32>
    %50 = arith.subf %46, %49 : vector<4x8x8xf32>
    %51 = math.exp %50 : vector<4x8x8xf32>
    %cst_13 = arith.constant dense<0.000000e+00> : vector<4x8xf32>
    %52 = vector.multi_reduction <add>, %51, %cst_13 [2] : vector<4x8x8xf32> to vector<4x8xf32>
    %53 = vector.shape_cast %52 : vector<4x8xf32> to vector<4x8x1xf32>
    %54 = vector.broadcast %53 : vector<4x8x1xf32> to vector<4x8x8xf32>
    %55 = arith.divf %51, %54 : vector<4x8x8xf32>
    %56 = arith.truncf %55 : vector<4x8x8xf32> to vector<4x8x8xbf16>
    "tpu.trace_start"() <{level = 10 : i32, message = "bij,bjk->bik"}> : () -> ()
    %cst_14 = arith.constant dense<0.000000e+00> : vector<4x8x8xf32>
    %57 = tpu.matmul %56, %45, %cst_14 {dimension_numbers = #tpu.dot_dimension_numbers<[2], [1], [1], [2], [0, 0, 0, 1, 1, 2], [0], [0]>} : vector<4x8x8xbf16>, vector<4x8x8xbf16>, vector<4x8x8xf32> -> vector<4x8x8xf32>
    "tpu.trace_stop"() : () -> ()
    %58 = vector.extract_strided_slice %57 {offsets = [0, 0, 0], sizes = [2, 8, 8], strides = [1, 1, 1]} : vector<4x8x8xf32> to vector<2x8x8xf32>
    %59 = vector.extract_strided_slice %57 {offsets = [2, 0, 0], sizes = [2, 8, 8], strides = [1, 1, 1]} : vector<4x8x8xf32> to vector<2x8x8xf32>
    %60 = tpu.concatenate %58, %59 in 2 : vector<2x8x8xf32>, vector<2x8x8xf32> -> vector<2x8x16xf32>
    %61 = vector.shape_cast %60 : vector<2x8x16xf32> to vector<16x16xf32>
    %62 = arith.truncf %61 : vector<16x16xf32> to vector<16x16xbf16>
    %c0_15 = arith.constant 0 : index
    %c0_16 = arith.constant 0 : index
    %63 = vector.load %arg4[%c0_15, %c0_16] : memref<16x32xbf16, #tpu.memory_space<vmem>>, vector<16x32xbf16>
    %cst_17 = arith.constant dense<0.000000e+00> : vector<16x32xf32>
    %64 = tpu.matmul %62, %63, %cst_17 {dimension_numbers = #tpu.dot_dimension_numbers<[1], [0], [0], [1], [0, 0, 1, 1], [], []>} : vector<16x16xbf16>, vector<16x32xbf16>, vector<16x32xf32> -> vector<16x32xf32>
    %65 = vector.broadcast %7 : vector<1x32xf32> to vector<16x32xf32>
    %66 = arith.addf %64, %65 : vector<16x32xf32>
    %67 = arith.addf %66, %1 : vector<16x32xf32>
    %cst_18 = arith.constant dense<0.000000e+00> : vector<16xf32>
    %68 = vector.multi_reduction <add>, %67, %cst_18 [1] : vector<16x32xf32> to vector<16xf32>
    %69 = vector.shape_cast %68 : vector<16xf32> to vector<16x1xf32>
    %cst_19 = arith.constant 3.200000e+01 : f32
    %70 = vector.broadcast %cst_19 : f32 to vector<16x1xf32>
    %71 = arith.divf %69, %70 : vector<16x1xf32>
    %72 = vector.broadcast %71 : vector<16x1xf32> to vector<16x32xf32>
    %73 = arith.subf %67, %72 : vector<16x32xf32>
    %74 = arith.mulf %73, %73 : vector<16x32xf32>
    %cst_20 = arith.constant dense<0.000000e+00> : vector<16xf32>
    %75 = vector.multi_reduction <add>, %74, %cst_20 [1] : vector<16x32xf32> to vector<16xf32>
    %76 = vector.shape_cast %75 : vector<16xf32> to vector<16x1xf32>
    %cst_21 = arith.constant 3.200000e+01 : f32
    %77 = vector.broadcast %cst_21 : f32 to vector<16x1xf32>
    %78 = arith.divf %76, %77 : vector<16x1xf32>
    %79 = vector.broadcast %71 : vector<16x1xf32> to vector<16x32xf32>
    %80 = arith.subf %67, %79 : vector<16x32xf32>
    %cst_22 = arith.constant 9.99999974E-6 : f32
    %81 = vector.broadcast %cst_22 : f32 to vector<16x1xf32>
    %82 = arith.addf %78, %81 : vector<16x1xf32>
    %83 = math.rsqrt %82 : vector<16x1xf32>
    %84 = vector.broadcast %83 : vector<16x1xf32> to vector<16x32xf32>
    %85 = arith.mulf %80, %84 : vector<16x32xf32>
    %86 = vector.broadcast %5 : vector<1x32xf32> to vector<16x32xf32>
    %87 = arith.mulf %85, %86 : vector<16x32xf32>
    %88 = vector.broadcast %6 : vector<1x32xf32> to vector<16x32xf32>
    %89 = arith.addf %87, %88 : vector<16x32xf32>
    %90 = arith.truncf %89 : vector<16x32xf32> to vector<16x32xbf16>
    %c0_23 = arith.constant 0 : index
    %c0_24 = arith.constant 0 : index
    %91 = vector.load %arg5[%c0_23, %c0_24] : memref<32x32xbf16, #tpu.memory_space<vmem>>, vector<32x32xbf16>
    %cst_25 = arith.constant dense<0.000000e+00> : vector<16x32xf32>
    %92 = tpu.matmul %90, %91, %cst_25 {dimension_numbers = #tpu.dot_dimension_numbers<[1], [0], [0], [1], [0, 0, 1, 1], [], []>} : vector<16x32xbf16>, vector<32x32xbf16>, vector<16x32xf32> -> vector<16x32xf32>
    %93 = vector.broadcast %8 : vector<1x32xf32> to vector<16x32xf32>
    %94 = arith.addf %92, %93 : vector<16x32xf32>
    %cst_26 = arith.constant 0.000000e+00 : f32
    %95 = vector.broadcast %cst_26 : f32 to vector<16x32xf32>
    %96 = arith.maximumf %94, %95 : vector<16x32xf32>
    %97 = arith.truncf %96 : vector<16x32xf32> to vector<16x32xbf16>
    %c0_27 = arith.constant 0 : index
    %c0_28 = arith.constant 0 : index
    %98 = vector.load %arg6[%c0_27, %c0_28] : memref<32x32xbf16, #tpu.memory_space<vmem>>, vector<32x32xbf16>
    %cst_29 = arith.constant dense<0.000000e+00> : vector<16x32xf32>
    %99 = tpu.matmul %97, %98, %cst_29 {dimension_numbers = #tpu.dot_dimension_numbers<[1], [0], [0], [1], [0, 0, 1, 1], [], []>} : vector<16x32xbf16>, vector<32x32xbf16>, vector<16x32xf32> -> vector<16x32xf32>
    %100 = vector.broadcast %9 : vector<1x32xf32> to vector<16x32xf32>
    %101 = arith.addf %99, %100 : vector<16x32xf32>
    %102 = arith.addf %101, %1 : vector<16x32xf32>
    %103 = vector.shape_cast %102 : vector<16x32xf32> to vector<2x8x32xf32>
    %c0_30 = arith.constant 0 : index
    %c0_31 = arith.constant 0 : index
    %c0_32 = arith.constant 0 : index
    %104 = vector.load %arg7[%c0_30, %c0_31, %c0_32] : memref<2x8x32xf32, #tpu.memory_space<vmem>>, vector<2x8x32xf32>
    tpu.vector_store %arg7[%c0_30, %c0_31, %c0_32], %103 {strides = array<i32>} : memref<2x8x32xf32, #tpu.memory_space<vmem>>, vector<2x8x32xf32>,
    return
  }
  func.func @transform_0(%arg0: i32) -> (i32, i32, i32) {
    %c0_i32 = arith.constant 0 : i32
    %c0_i32_0 = arith.constant 0 : i32
    %c0_i32_1 = arith.constant 0 : i32
    return %arg0, %c0_i32, %c0_i32_0 : i32, i32, i32
  }
  func.func @transform_1(%arg0: i32) -> (i32, i32) {
    %c0_i32 = arith.constant 0 : i32
    %c0_i32_0 = arith.constant 0 : i32
    %c0_i32_1 = arith.constant 0 : i32
    return %c0_i32, %c0_i32_0 : i32, i32
  }
  func.func @transform_2(%arg0: i32) -> (i32, i32) {
    %c0_i32 = arith.constant 0 : i32
    %c0_i32_0 = arith.constant 0 : i32
    %c0_i32_1 = arith.constant 0 : i32
    return %c0_i32, %c0_i32_0 : i32, i32
  }
  func.func @transform_3(%arg0: i32) -> (i32, i32) {
    %c0_i32 = arith.constant 0 : i32
    %c0_i32_0 = arith.constant 0 : i32
    %c0_i32_1 = arith.constant 0 : i32
    return %c0_i32, %c0_i32_0 : i32, i32
  }
  func.func @transform_4(%arg0: i32) -> (i32, i32) {
    %c0_i32 = arith.constant 0 : i32
    %c0_i32_0 = arith.constant 0 : i32
    %c0_i32_1 = arith.constant 0 : i32
    return %c0_i32, %c0_i32_0 : i32, i32
  }
  func.func @transform_5(%arg0: i32) -> (i32, i32) {
    %c0_i32 = arith.constant 0 : i32
    %c0_i32_0 = arith.constant 0 : i32
    %c0_i32_1 = arith.constant 0 : i32
    return %c0_i32, %c0_i32_0 : i32, i32
  }
  func.func @transform_6(%arg0: i32) -> (i32, i32, i32) {
    %c0_i32 = arith.constant 0 : i32
    %c0_i32_0 = arith.constant 0 : i32
    %c0_i32_1 = arith.constant 0 : i32
    return %arg0, %c0_i32, %c0_i32_0 : i32, i32, i32
  }
}

module attributes {stable_mosaic.version = 11 : i64} {
  func.func @latent_attention_kernel(%arg0: i32, %arg1: memref<2x8x32xf32, #tpu.memory_space<vmem>>, %arg2: memref<8x32xf32, #tpu.memory_space<vmem>>, %arg3: memref<32x48xbf16, #tpu.memory_space<vmem>>, %arg4: memref<16x32xbf16, #tpu.memory_space<vmem>>, %arg5: memref<32x32xbf16, #tpu.memory_space<vmem>>, %arg6: memref<32x32xbf16, #tpu.memory_space<vmem>>, %arg7: memref<2x8x32xf32, #tpu.memory_space<vmem>>) attributes {dimension_semantics = [#tpu.dimension_semantics<parallel>], iteration_bounds = array<i64: 2>, scalar_prefetch = 0 : i64, scratch_operands = 0 : i64, tpu.core_type = #tpu.core_type<tc>, window_params = [{transform_indices = @transform_0, window_bounds = array<i64: 2, 8, 32>}, {pipeline_mode = #tpu.pipeline_mode<synchronous>, transform_indices = @transform_1, window_bounds = array<i64: 8, 32>}, {pipeline_mode = #tpu.pipeline_mode<synchronous>, transform_indices = @transform_2, window_bounds = array<i64: 32, 48>}, {pipeline_mode = #tpu.pipeline_mode<synchronous>, transform_indices = @transform_3, window_bounds = array<i64: 16, 32>}, {pipeline_mode = #tpu.pipeline_mode<synchronous>, transform_indices = @transform_4, window_bounds = array<i64: 32, 32>}, {pipeline_mode = #tpu.pipeline_mode<synchronous>, transform_indices = @transform_5, window_bounds = array<i64: 32, 32>}, {transform_indices = @transform_6, window_bounds = array<i64: 2, 8, 32>}]} {
    %c0 = arith.constant 0 : index
    %c0_0 = arith.constant 0 : index
    %c0_1 = arith.constant 0 : index
    %0 = vector.load %arg1[%c0, %c0_0, %c0_1] : memref<2x8x32xf32, #tpu.memory_space<vmem>>, vector<2x8x32xf32>
    %1 = vector.shape_cast %0 : vector<2x8x32xf32> to vector<16x32xf32>
    %c0_2 = arith.constant 0 : index
    %c0_3 = arith.constant 0 : index
    %2 = vector.load %arg2[%c0_2, %c0_3] : memref<8x32xf32, #tpu.memory_space<vmem>>, vector<8x32xf32>
    %3 = vector.extract_strided_slice %2 {offsets = [0, 0], sizes = [1, 32], strides = [1, 1]} : vector<8x32xf32> to vector<1x32xf32>
    %4 = vector.extract_strided_slice %2 {offsets = [1, 0], sizes = [1, 32], strides = [1, 1]} : vector<8x32xf32> to vector<1x32xf32>
    %5 = vector.extract_strided_slice %2 {offsets = [2, 0], sizes = [1, 32], strides = [1, 1]} : vector<8x32xf32> to vector<1x32xf32>
    %6 = vector.extract_strided_slice %2 {offsets = [3, 0], sizes = [1, 32], strides = [1, 1]} : vector<8x32xf32> to vector<1x32xf32>
    %7 = vector.extract_strided_slice %2 {offsets = [4, 0], sizes = [1, 32], strides = [1, 1]} : vector<8x32xf32> to vector<1x32xf32>
    %8 = vector.extract_strided_slice %2 {offsets = [5, 0], sizes = [1, 32], strides = [1, 1]} : vector<8x32xf32> to vector<1x32xf32>
    %9 = vector.extract_strided_slice %2 {offsets = [6, 0], sizes = [1, 32], strides = [1, 1]} : vector<8x32xf32> to vector<1x32xf32>
    %cst = arith.constant dense<0.000000e+00> : vector<16xf32>
    %10 = vector.multi_reduction <add>, %1, %cst [1] : vector<16x32xf32> to vector<16xf32>
    %11 = vector.shape_cast %10 : vector<16xf32> to vector<16x1xf32>
    %cst_4 = arith.constant 3.200000e+01 : f32
    %12 = vector.broadcast %cst_4 : f32 to vector<16x1xf32>
    %13 = arith.divf %11, %12 : vector<16x1xf32>
    %14 = vector.broadcast %13 : vector<16x1xf32> to vector<16x32xf32>
    %15 = arith.subf %1, %14 : vector<16x32xf32>
    %16 = arith.mulf %15, %15 : vector<16x32xf32>
    %cst_5 = arith.constant dense<0.000000e+00> : vector<16xf32>
    %17 = vector.multi_reduction <add>, %16, %cst_5 [1] : vector<16x32xf32> to vector<16xf32>
    %18 = vector.shape_cast %17 : vector<16xf32> to vector<16x1xf32>
    %cst_6 = arith.constant 3.200000e+01 : f32
    %19 = vector.broadcast %cst_6 : f32 to vector<16x1xf32>
    %20 = arith.divf %18, %19 : vector<16x1xf32>
    %21 = vector.broadcast %13 : vector<16x1xf32> to vector<16x32xf32>
    %22 = arith.subf %1, %21 : vector<16x32xf32>
    %cst_7 = arith.constant 9.99999974E-6 : f32
    %23 = vector.broadcast %cst_7 : f32 to vector<16x1xf32>
    %24 = arith.addf %20, %23 : vector<16x1xf32>
    %25 = math.rsqrt %24 : vector<16x1xf32>
    %26 = vector.broadcast %25 : vector<16x1xf32> to vector<16x32xf32>
    %27 = arith.mulf %22, %26 : vector<16x32xf32>
    %28 = vector.broadcast %3 : vector<1x32xf32> to vector<16x32xf32>
    %29 = arith.mulf %27, %28 : vector<16x32xf32>
    %30 = vector.broadcast %4 : vector<1x32xf32> to vector<16x32xf32>
    %31 = arith.addf %29, %30 : vector<16x32xf32>
    %32 = arith.truncf %31 : vector<16x32xf32> to vector<16x32xbf16>
    %c0_8 = arith.constant 0 : index
    %c0_9 = arith.constant 0 : index
    %33 = vector.load %arg3[%c0_8, %c0_9] : memref<32x48xbf16, #tpu.memory_space<vmem>>, vector<32x48xbf16>
    %cst_10 = arith.constant dense<0.000000e+00> : vector<16x48xf32>
    %34 = tpu.matmul %32, %33, %cst_10 {dimension_numbers = #tpu.dot_dimension_numbers<[1], [0], [0], [1], [0, 0, 1, 1], [], []>} : vector<16x32xbf16>, vector<32x48xbf16>, vector<16x48xf32> -> vector<16x48xf32>
    %35 = vector.extract_strided_slice %34 {offsets = [0, 0], sizes = [16, 24], strides = [1, 1]} : vector<16x48xf32> to vector<16x24xf32>
    %36 = vector.shape_cast %35 : vector<16x24xf32> to vector<2x8x24xf32>
    %37 = vector.extract_strided_slice %34 {offsets = [0, 24], sizes = [16, 24], strides = [1, 1]} : vector<16x48xf32> to vector<16x24xf32>
    %38 = vector.shape_cast %37 : vector<16x24xf32> to vector<2x8x24xf32>
    %39 = tpu.concatenate %36, %38 in 0 : vector<2x8x24xf32>, vector<2x8x24xf32> -> vector<4x8x24xf32>
    %40 = vector.extract_strided_slice %39 {offsets = [0, 0, 0], sizes = [4, 8, 8], strides = [1, 1, 1]} : vector<4x8x24xf32> to vector<4x8x8xf32>
    %41 = arith.truncf %40 : vector<4x8x8xf32> to vector<4x8x8xbf16>
    %42 = vector.extract_strided_slice %39 {offsets = [0, 0, 8], sizes = [4, 8, 8], strides = [1, 1, 1]} : vector<4x8x24xf32> to vector<4x8x8xf32>
    %43 = arith.truncf %42 : vector<4x8x8xf32> to vector<4x8x8xbf16>
    %44 = vector.extract_strided_slice %39 {offsets = [0, 0, 16], sizes = [4, 8, 8], strides = [1, 1, 1]} : vector<4x8x24xf32> to vector<4x8x8xf32>
    %45 = arith.truncf %44 : vector<4x8x8xf32> to vector<4x8x8xbf16>
    "tpu.trace_start"() <{level = 10 : i32, message = "bik,bjk->bij"}> : () -> ()
    %cst_11 = arith.constant dense<0.000000e+00> : vector<4x8x8xf32>
    %46 = tpu.matmul %41, %43, %cst_11 {dimension_numbers = #tpu.dot_dimension_numbers<[2], [2], [1], [1], [0, 0, 0, 1, 1, 1], [0], [0]>} : vector<4x8x8xbf16>, vector<4x8x8xbf16>, vector<4x8x8xf32> -> vector<4x8x8xf32>
    "tpu.trace_stop"() : () -> ()
    %cst_12 = arith.constant dense<0xFF800000> : vector<4x8xf32>
    %47 = vector.multi_reduction <maximumf>, %46, %cst_12 [2] : vector<4x8x8xf32> to vector<4x8xf32>
    %48 = vector.shape_cast %47 : vector<4x8xf32> to vector<4x8x1xf32>
    %49 = vector.broadcast %48 : vector<4x8x1xf32> to vector<4x8x8xf32>
    %50 = arith.subf %46, %49 : vector<4x8x8xf32>
    %51 = math.exp %50 : vector<4x8x8xf32>
    %cst_13 = arith.constant dense<0.000000e+00> : vector<4x8xf32>
    %52 = vector.multi_reduction <add>, %51, %cst_13 [2] : vector<4x8x8xf32> to vector<4x8xf32>
    %53 = vector.shape_cast %52 : vector<4x8xf32> to vector<4x8x1xf32>
    %54 = vector.broadcast %53 : vector<4x8x1xf32> to vector<4x8x8xf32>
    %55 = arith.divf %51, %54 : vector<4x8x8xf32>
    %56 = arith.truncf %55 : vector<4x8x8xf32> to vector<4x8x8xbf16>
    "tpu.trace_start"() <{level = 10 : i32, message = "bij,bjk->bik"}> : () -> ()
    %cst_14 = arith.constant dense<0.000000e+00> : vector<4x8x8xf32>
    %57 = tpu.matmul %56, %45, %cst_14 {dimension_numbers = #tpu.dot_dimension_numbers<[2], [1], [1], [2], [0, 0, 0, 1, 1, 2], [0], [0]>} : vector<4x8x8xbf16>, vector<4x8x8xbf16>, vector<4x8x8xf32> -> vector<4x8x8xf32>
    "tpu.trace_stop"() : () -> ()
    %58 = vector.extract_strided_slice %57 {offsets = [0, 0, 0], sizes = [2, 8, 8], strides = [1, 1, 1]} : vector<4x8x8xf32> to vector<2x8x8xf32>
    %59 = vector.extract_strided_slice %57 {offsets = [2, 0, 0], sizes = [2, 8, 8], strides = [1, 1, 1]} : vector<4x8x8xf32> to vector<2x8x8xf32>
    %60 = tpu.concatenate %58, %59 in 2 : vector<2x8x8xf32>, vector<2x8x8xf32> -> vector<2x8x16xf32>
    %61 = vector.shape_cast %60 : vector<2x8x16xf32> to vector<16x16xf32>
    %62 = arith.truncf %61 : vector<16x16xf32> to vector<16x16xbf16>
    %c0_15 = arith.constant 0 : index
    %c0_16 = arith.constant 0 : index
    %63 = vector.load %arg4[%c0_15, %c0_16] : memref<16x32xbf16, #tpu.memory_space<vmem>>, vector<16x32xbf16>
    %cst_17 = arith.constant dense<0.000000e+00> : vector<16x32xf32>
    %64 = tpu.matmul %62, %63, %cst_17 {dimension_numbers = #tpu.dot_dimension_numbers<[1], [0], [0], [1], [0, 0, 1, 1], [], []>} : vector<16x16xbf16>, vector<16x32xbf16>, vector<16x32xf32> -> vector<16x32xf32>
    %65 = vector.broadcast %7 : vector<1x32xf32> to vector<16x32xf32>
    %66 = arith.addf %64, %65 : vector<16x32xf32>
    %67 = arith.addf %66, %1 : vector<16x32xf32>
    %cst_18 = arith.constant dense<0.000000e+00> : vector<16xf32>
    %68 = vector.multi_reduction <add>, %67, %cst_18 [1] : vector<16x32xf32> to vector<16xf32>
    %69 = vector.shape_cast %68 : vector<16xf32> to vector<16x1xf32>
    %cst_19 = arith.constant 3.200000e+01 : f32
    %70 = vector.broadcast %cst_19 : f32 to vector<16x1xf32>
    %71 = arith.divf %69, %70 : vector<16x1xf32>
    %72 = vector.broadcast %71 : vector<16x1xf32> to vector<16x32xf32>
    %73 = arith.subf %67, %72 : vector<16x32xf32>
    %74 = arith.mulf %73, %73 : vector<16x32xf32>
    %cst_20 = arith.constant dense<0.000000e+00> : vector<16xf32>
    %75 = vector.multi_reduction <add>, %74, %cst_20 [1] : vector<16x32xf32> to vector<16xf32>
    %76 = vector.shape_cast %75 : vector<16xf32> to vector<16x1xf32>
    %cst_21 = arith.constant 3.200000e+01 : f32
    %77 = vector.broadcast %cst_21 : f32 to vector<16x1xf32>
    %78 = arith.divf %76, %77 : vector<16x1xf32>
    %79 = vector.broadcast %71 : vector<16x1xf32> to vector<16x32xf32>
    %80 = arith.subf %67, %79 : vector<16x32xf32>
    %cst_22 = arith.constant 9.99999974E-6 : f32
    %81 = vector.broadcast %cst_22 : f32 to vector<16x1xf32>
    %82 = arith.addf %78, %81 : vector<16x1xf32>
    %83 = math.rsqrt %82 : vector<16x1xf32>
    %84 = vector.broadcast %83 : vector<16x1xf32> to vector<16x32xf32>
    %85 = arith.mulf %80, %84 : vector<16x32xf32>
    %86 = vector.broadcast %5 : vector<1x32xf32> to vector<16x32xf32>
    %87 = arith.mulf %85, %86 : vector<16x32xf32>
    %88 = vector.broadcast %6 : vector<1x32xf32> to vector<16x32xf32>
    %89 = arith.addf %87, %88 : vector<16x32xf32>
    %90 = arith.truncf %89 : vector<16x32xf32> to vector<16x32xbf16>
    %c0_23 = arith.constant 0 : index
    %c0_24 = arith.constant 0 : index
    %91 = vector.load %arg5[%c0_23, %c0_24] : memref<32x32xbf16, #tpu.memory_space<vmem>>, vector<32x32xbf16>
    %cst_25 = arith.constant dense<0.000000e+00> : vector<16x32xf32>
    %92 = tpu.matmul %90, %91, %cst_25 {dimension_numbers = #tpu.dot_dimension_numbers<[1], [0], [0], [1], [0, 0, 1, 1], [], []>} : vector<16x32xbf16>, vector<32x32xbf16>, vector<16x32xf32> -> vector<16x32xf32>
    %93 = vector.broadcast %8 : vector<1x32xf32> to vector<16x32xf32>
    %94 = arith.addf %92, %93 : vector<16x32xf32>
    %cst_26 = arith.constant 0.000000e+00 : f32
    %95 = vector.broadcast %cst_26 : f32 to vector<16x32xf32>
    %96 = arith.maximumf %94, %95 : vector<16x32xf32>
    %97 = arith.truncf %96 : vector<16x32xf32> to vector<16x32xbf16>
    %c0_27 = arith.constant 0 : index
    %c0_28 = arith.constant 0 : index
    %98 = vector.load %arg6[%c0_27, %c0_28] : memref<32x32xbf16, #tpu.memory_space<vmem>>, vector<32x32xbf16>
    %cst_29 = arith.constant dense<0.000000e+00> : vector<16x32xf32>
    %99 = tpu.matmul %97, %98, %cst_29 {dimension_numbers = #tpu.dot_dimension_numbers<[1], [0], [0], [1], [0, 0, 1, 1], [], []>} : vector<16x32xbf16>, vector<32x32xbf16>, vector<16x32xf32> -> vector<16x32xf32>
    %100 = vector.broadcast %9 : vector<1x32xf32> to vector<16x32xf32>
    %101 = arith.addf %99, %100 : vector<16x32xf32>
    %102 = arith.addf %101, %1 : vector<16x32xf32>
    %103 = vector.shape_cast %102 : vector<16x32xf32> to vector<2x8x32xf32>
    %c0_30 = arith.constant 0 : index
    %c0_31 = arith.constant 0 : index
    %c0_32 = arith.constant 0 : index
    %104 = vector.load %arg7[%c0_30, %c0_31, %c0_32] : memref<2x8x32xf32, #tpu.memory_space<vmem>>, vector<2x8x32xf32>
    tpu.vector_store %arg7[%c0_30, %c0_31, %c0_32], %103 {strides = array<i32>} : memref<2x8x32xf32, #tpu.memory_space<vmem>>, vector<2x8x32xf32>,
    return
  }
  func.func @transform_0(%arg0: i32) -> (i32, i32, i32) {
    %c0_i32 = arith.constant 0 : i32
    %c0_i32_0 = arith.constant 0 : i32
    %c0_i32_1 = arith.constant 0 : i32
    return %arg0, %c0_i32, %c0_i32_0 : i32, i32, i32
  }
  func.func @transform_1(%arg0: i32) -> (i32, i32) {
    %c0_i32 = arith.constant 0 : i32
    %c0_i32_0 = arith.constant 0 : i32
    %c0_i32_1 = arith.constant 0 : i32
    return %c0_i32, %c0_i32_0 : i32, i32
  }
  func.func @transform_2(%arg0: i32) -> (i32, i32) {
    %c0_i32 = arith.constant 0 : i32
    %c0_i32_0 = arith.constant 0 : i32
    %c0_i32_1 = arith.constant 0 : i32
    return %c0_i32, %c0_i32_0 : i32, i32
  }
  func.func @transform_3(%arg0: i32) -> (i32, i32) {
    %c0_i32 = arith.constant 0 : i32
    %c0_i32_0 = arith.constant 0 : i32
    %c0_i32_1 = arith.constant 0 : i32
    return %c0_i32, %c0_i32_0 : i32, i32
  }
  func.func @transform_4(%arg0: i32) -> (i32, i32) {
    %c0_i32 = arith.constant 0 : i32
    %c0_i32_0 = arith.constant 0 : i32
    %c0_i32_1 = arith.constant 0 : i32
    return %c0_i32, %c0_i32_0 : i32, i32
  }
  func.func @transform_5(%arg0: i32) -> (i32, i32) {
    %c0_i32 = arith.constant 0 : i32
    %c0_i32_0 = arith.constant 0 : i32
    %c0_i32_1 = arith.constant 0 : i32
    return %c0_i32, %c0_i32_0 : i32, i32
  }
  func.func @transform_6(%arg0: i32) -> (i32, i32, i32) {
    %c0_i32 = arith.constant 0 : i32
    %c0_i32_0 = arith.constant 0 : i32
    %c0_i32_1 = arith.constant 0 : i32
    return %arg0, %c0_i32, %c0_i32_0 : i32, i32, i32
  }
}

</mosaic_0001>

<bundles_post_ra>
// kernel: tpu_custom_call.1
= control target key start
LH: loop header
LB: loop body
LE: loop exit
PB: predicated region body
PF: predicated region fallthrough
CT: control target
= control target key end

     0   :  { %11 = vsyncpa [#allocation3], 0  ;;  %s2241_s0 = inlined_call_operand.hbm [shape: f32[4,8,32], index: 0, kind: input, shape index: {}]   ;;  %s2242_s1 = inlined_call_operand.hbm [shape: f32[8,32], index: 1, kind: input, shape index: {}]   ;;  %s2243_s2 = inlined_call_operand.hbm [shape: bf16[32,48], index: 2, kind: input, shape index: {}]   ;;  %s2244_s3 = inlined_call_operand.hbm [shape: bf16[16,32], index: 3, kind: input, shape index: {}]   ;;  %s2245_s4 = inlined_call_operand.hbm [shape: bf16[32,32], index: 4, kind: input, shape index: {}]   ;;  %s2246_s5 = inlined_call_operand.hbm [shape: bf16[32,32], index: 5, kind: input, shape index: {}]   ;;  %s2247_s6 = inlined_call_operand.hbm [shape: f32[4,8,32], index: 6, kind: output, shape index: {}]  }
   0x1   :  { %13 = vsyncpa [#allocation3 + $0x1], 0 }
   0x2   :  { %14 = vsyncpa [#allocation6], 0 }
   0x3   :  { %15 = vsyncpa [#allocation9], 0 }
   0x4   :  { %16 = vsyncpa [#allocation12], 0 }
   0x5   :  { %17 = vsyncpa [#allocation4], 0 }
   0x6   :  { %19 = vsyncpa [#allocation4 + $0x1], 0  ;;  %s1865_s21 = smov 0   ;;  %s1867_s22 = smov 0  }
   0x7   :  { %s1869_s23 = smov 0   ;;  %s1871_s24 = smov 0  }
   0x8 LB: > { %s1812_s25 = smov [#allocation5]   ;;  %s1886_s27 = sadd.s32 4294967295, %s1810_s24   ;;  %s1810_s24 = sphi %s1871_s24, %s2273_s24   ;;  %s1806_s23 = sphi %s1869_s23, %s2272_s23   ;;  %s1802_s22 = sphi %s1867_s22, %s2271_s22   ;;  %s1798_s21 = sphi %s1865_s21, %s2270_s21  }
   0x9   : > { %s200_s26 = sshll.u32 %s1812_s25, 4  ;;  %p1278_p0 = scmp.ge.s32.totalorder %s1810_s24, 1  ;;  %s201_s26 = int_to_ptr.vmem [resolvable:$true] %s200_s26 }
   0xa   : > { %p2248_p1 = scmp.eq.s32.totalorder %s1886_s27, 0  ;;  %p187_p2 = scmp.lt.s32.totalorder %s1810_s24, 3 }
   0xb   : > { %s1813_s29 = smov [#allocation8]   ;;  %s1814_s8 = smov [#allocation7]  }
   0xc   : > { %p1891_p3 = pnand %p1278_p0, %p187_p2  ;;  %s223_s30 = sshll.u32 %s1813_s29, 4  ;;  %s1904_s30 = int_to_ptr.vmem [resolvable:$true] %s223_s30 }
   0xd   : > { %s210_s9 = sshll.u32 %s1814_s8, 4  ;;  %s1587_s11 = scalar_lea.vmem %s201_s26, 128  ;;  %s1906_s9 = int_to_ptr.vmem [resolvable:$true] %s210_s9 }
   0xe   : > { %s2252_s28 = scalar_select %p1891_p3, 1, 0 }
   0xf   : > { %p1451_p5 = pneg %p1891_p3  ;;  %p1588_p8 = scmp.ne.s32.totalorder %s201_s26, %s1587_s11 }
  0x10   : > { %p1595_p11 = scmp.lt.s32.totalorder %s201_s26, %s201_s26  ;;  %p1596_p12 = scmp.lt.s32.totalorder %s1587_s11, %s1587_s11 }
  0x11   : > { %p1900_p6 = pnand %p1451_p5, %p2248_p1 }
  0x12   : > { %p1597_p13 = por %p1596_p12, %p1595_p11 }
  0x13   : > { %p1910_p7 = pneg %p1900_p6 }
  0x15   : > { %p1590_p9 = pnand %p1588_p8, %p1910_p7 }
  0x17   : > { %p1591_p10 = pneg %p1590_p9 }
  0x19   : > { %p1598_p0 = pnand %p1597_p13, %p1591_p10 }
  0x1b   : > { %1601 = shalt.err (!%p1598_p0)
}
  0x1c   : > { %1454 = dma.hbm_to_vmem [thread:$0]  (!%p1900_p6), %s2242_s1, 128, %s201_s26, [#allocation6]  }
  0x1d   : > { %s1613_s14 = scalar_lea.vmem %s1904_s30, 128  ;;  %p1621_p9 = scmp.lt.s32.totalorder %s1904_s30, %s1904_s30 }
  0x1e   : > { %p1614_p2 = scmp.ne.s32.totalorder %s1904_s30, %s1613_s14  ;;  %p1622_p11 = scmp.lt.s32.totalorder %s1613_s14, %s1613_s14 }
  0x20   : > { %p1616_p5 = pnand %p1614_p2, %p1910_p7  ;;  %p1623_p10 = por %p1622_p11, %p1621_p9 }
  0x22   : > { %p1617_p8 = pneg %p1616_p5 }
  0x24   : > { %p1624_p12 = pnand %p1623_p10, %p1617_p8 }
  0x26   : > { %1627 = shalt.err (!%p1624_p12)
}
  0x27   : > { %s1815_s15 = smov 64   ;;  %s1816_s16 = smov 4  }
  0x28   : > { %1460 = dma.hbm_to_vmem [thread:$0]  (!%p1900_p6), %s2244_s3, 128, %s1904_s30, [#allocation9], %s1815_s15, %s1815_s15, %s1816_s16  }
  0x29   : > { %s1639_s19 = scalar_lea.vmem %s1906_s9, 256  ;;  %p1647_p5 = scmp.lt.s32.totalorder %s1906_s9, %s1906_s9 }
  0x2a   : > { %p1640_p13 = scmp.ne.s32.totalorder %s1906_s9, %s1639_s19  ;;  %p1648_p8 = scmp.lt.s32.totalorder %s1639_s19, %s1639_s19 }
  0x2c   : > { %p1642_p0 = pnand %p1640_p13, %p1910_p7  ;;  %p1649_p9 = por %p1648_p8, %p1647_p5 }
  0x2e   : > { %p1643_p2 = pneg %p1642_p0 }
  0x30   : > { %p1650_p11 = pnand %p1649_p9, %p1643_p2 }
  0x32   : > { %1653 = shalt.err (!%p1650_p11)
}
  0x33   : > { %1457 = dma.hbm_to_vmem [thread:$0]  (!%p1900_p6), %s2243_s2, 256, %s1906_s9, [#allocation6], %s1815_s15, %s1815_s15, %s1816_s16  }
  0x34   : > { %s1817_s26 = smov [#allocation10]   ;;  %s1818_s30 = smov [#allocation11]  }
  0x35   : > { %s236_s29 = sshll.u32 %s1817_s26, 4  ;;  %s249_s8 = sshll.u32 %s1818_s30, 4  ;;  %s237_s29 = int_to_ptr.vmem [resolvable:$true] %s236_s29  ;;  %s250_s8 = int_to_ptr.vmem [resolvable:$true] %s249_s8 }
  0x36   : > { %s1665_s11 = scalar_lea.vmem %s237_s29, 256  ;;  %p1673_p0 = scmp.lt.s32.totalorder %s237_s29, %s237_s29 }
  0x37   : > { %p1666_p10 = scmp.ne.s32.totalorder %s237_s29, %s1665_s11  ;;  %p1674_p2 = scmp.lt.s32.totalorder %s1665_s11, %s1665_s11 }
  0x39   : > { %p1668_p12 = pnand %p1666_p10, %p1910_p7  ;;  %p1675_p5 = por %p1674_p2, %p1673_p0 }
  0x3b   : > { %p1669_p13 = pneg %p1668_p12 }
  0x3d   : > { %p1676_p8 = pnand %p1675_p5, %p1669_p13 }
  0x3f   : > { %1679 = shalt.err (!%p1676_p8)
}
  0x40   : > { %1463 = dma.hbm_to_vmem [thread:$0]  (!%p1900_p6), %s2245_s4, 256, %s237_s29, [#allocation9], %s1815_s15, %s1815_s15, %s1816_s16  }
  0x41   : > { %s1691_s13 = scalar_lea.vmem %s250_s8, 256  ;;  %p1699_p12 = scmp.lt.s32.totalorder %s250_s8, %s250_s8 }
  0x42   : > { %p1692_p9 = scmp.ne.s32.totalorder %s250_s8, %s1691_s13  ;;  %p1700_p0 = scmp.lt.s32.totalorder %s1691_s13, %s1691_s13 }
  0x44   : > { %p1694_p11 = pnand %p1692_p9, %p1910_p7  ;;  %p1701_p13 = por %p1700_p0, %p1699_p12 }
  0x46   : > { %p1695_p10 = pneg %p1694_p11 }
  0x48   : > { %p1702_p2 = pnand %p1701_p13, %p1695_p10 }
  0x4a   : > { %1705 = shalt.err (!%p1702_p2)
}
  0x4b   : > { %1466 = dma.hbm_to_vmem [thread:$0]  (!%p1900_p6), %s2246_s5, 256, %s250_s8, [#allocation12], %s1815_s15, %s1815_s15, %s1816_s16  }
  0x4c   : > { %s1277_s7 = sadd.s32 4294967294, %s1810_s24   ;;  %s1973_s10 = sadd.s32 1, %s1810_s24  }
  0x4d   : > { %s32_s18 = sadd.s32 1, %s1806_s23  ;;  %s29_s19 = ssub.s32 %s1810_s24, %s1973_s10 }
  0x4e   : > { %p39_p7 = scmp.ne.s32.totalorder %s1806_s23, %s1802_s22  ;;  %p30_p5 = scmp.eq.s32.totalorder %s29_s19, 0 }
  0x4f   : > { %p40_p8 = scmp.eq.s32.totalorder %s1810_s24, 0  ;;  %p45_p9 = scmp.ne.s32.totalorder %s1802_s22, %s1798_s21 }
  0x50   : > { %p174_p11 = scmp.eq.s32.totalorder %s1886_s27, 1  ;;  %p180_p0 = scmp.eq.s32.totalorder %s1277_s7, 1 }
  0x51   : > { %s1985_s20 = scalar_select %p30_p5, %s1806_s23, %s32_s18  }
  0x52   : > { %p41_p10 = por %p40_p8, %p39_p7  ;;  %p1989_p12 = por %p2248_p1, %p45_p9 }
  0x53   : > { %p1993_p6 = por %p174_p11, %p39_p7  ;;  %p1480_p13 = scmp.lt.s32.totalorder %s1810_s24, 2 }
  0x54   : > { %s2255_s25 = scalar_select %p1989_p12, 1, 0 }
  0x55   : > { %s2256_s15 = scalar_select %p1993_p6, 1, 0 }
  0x56   : > { %s263_s16 = sand.u32 1, %s1806_s23   ;;  %p1999_p2 = por %p180_p0, %p45_p9 }
  0x57   : > { %s1285_s29 = sshll.u32 %s263_s16, 4  ;;  %s1320_s30 = sshll.u32 %s1810_s24, 8 }
  0x58   : > { %s2257_s26 = scalar_select %p1999_p2, 1, 0 }
  0x59   : > { %s2007_s9 = scalar_lea.hbm %s2241_s0, %s1320_s30  ;;  %s267_s12 = scalar_lea.vmem [#allocation2], %s1285_s29 }
  0x5a   : > { %s274_s13 = sshll.u32 %s267_s12, 4  ;;  %p2009_p7 = pnand %p1480_p13, %p41_p10  ;;  %s2013_s13 = int_to_ptr.vmem [resolvable:$true] %s274_s13 }
  0x5b   : > { %s2015_s17 = scalar_lea.sflag [#allocation3], %s263_s16  ;;  %s1706_s7 = scalar_lea.hbm %s2007_s9, 256 }
  0x5c   : > { %p1707_p5 = scmp.ne.s32.totalorder %s2007_s9, %s1706_s7  ;;  %p1708_p8 = pneg %p2009_p7 }
  0x5d   : > { %s1711_s29 = scalar_lea.hbm %s2241_s0, 512  ;;  %p1712_p10 = scmp.lt.s32.totalorder %s2007_s9, %s2241_s0 }
  0x5e   : > { %p1709_p9 = pnand %p1708_p8, %p1707_p5  ;;  %p1713_p0 = scmp.lt.s32.totalorder %s1711_s29, %s1706_s7 }
  0x60   : > { %p1710_p11 = pneg %p1709_p9  ;;  %p1714_p13 = por %p1713_p0, %p1712_p10 }
  0x62   : > { %p1715_p4 = pnand %p1714_p13, %p1710_p11 }
  0x64   : > { %1718 = shalt.err (!%p1715_p4)
}
  0x65   : > { %s1719_s16 = scalar_lea.vmem %s2013_s13, 256  ;;  %s1819_s11 = smov [#allocation2]  }
  0x66   : > { %p1720_p1 = scmp.ne.s32.totalorder %s2013_s13, %s1719_s16  ;;  %s1724_s12 = sshll.u32 %s1819_s11, 4  ;;  %s1725_s12 = int_to_ptr.vmem [resolvable:$false] %s1724_s12 }
  0x67   : > { %s1726_s18 = scalar_lea.vmem %s1725_s12, 512  ;;  %p1727_p9 = scmp.lt.s32.totalorder %s2013_s13, %s1725_s12 }
  0x68   : > { %p1722_p2 = pnand %p1720_p1, %p1708_p8  ;;  %p1728_p6 = scmp.lt.s32.totalorder %s1726_s18, %s1719_s16 }
  0x6a   : > { %p1723_p5 = pneg %p1722_p2  ;;  %p1729_p12 = por %p1728_p6, %p1727_p9 }
  0x6c   : > { %p1730_p3 = pnand %p1729_p12, %p1723_p5 }
  0x6e   : > { %1733 = shalt.err (!%p1730_p3)
}
  0x6f   : > { %s1820_s7 = smov 128   ;;  %s1821_s19 = smov 8  }
  0x70   : > { %1470 = dma.hbm_to_vmem [thread:$0]  (!%p2009_p7), %s2007_s9, 256, %s2013_s13, %s2015_s17, %s1820_s7, %s1820_s7, %s1821_s19  }
  0x71   : > { %p2259_p1 = scmp.ne.s32.totalorder %s2252_s28, 0 }
  0x72   : > { %s2039_s29 = sand.u32 (!%p2259_p1), 1, %s1802_s22   ;;  %p2260_p3 = scmp.ne.s32.totalorder (!%p2259_p1), %s2255_s25, 0 }
  0x73   : > { %286 = sbr.rel (%p2259_p1) target bundleno = 2643 (0xa53), region = 44  ;;  %s1289_s30 = sshll.u32 (!%p2259_p1), %s2039_s29, 4 }
  0x74   : > { %s289_s8 = scalar_lea.sflag (!%p2259_p1), [#allocation3], %s2039_s29  ;;  %s292_s16 = scalar_lea.vmem (!%p2259_p1), [#allocation2], %s1289_s30 }
  0x78   : > { %1777 = dma.done.wait (%p2260_p3), %s289_s8, 256  }
  0x79   : > { %1779 = vsyncadd (%p2260_p3), %s289_s8, 4294967040  ;;  %p2261_p4 = scmp.eq.s32.totalorder %s1886_s27, 0 }
  0x7b   : > { %1781 = dma.done.wait (%p2261_p4), [#allocation6], 384   ;;  %p2262_p12 = pmov %p2261_p4 }
  0x7c   : > { %p2263_p6 = pmov %p2261_p4 }
  0x7d   : > { %1783 = vsyncadd (%p2262_p12), [#allocation6], 4294966912 }
  0x7e   : > { %1785 = dma.done.wait (%p2263_p6), [#allocation9], 384   ;;  %p2264_p2 = pmov %p2261_p4 }
  0x80   : > { %1787 = vsyncadd (%p2264_p2), [#allocation9], 4294966912  ;;  %p2265_p7 = pmov %p2264_p2 }
  0x81   : > { %p2266_p8 = pmov %p2264_p2 }
  0x82   : > { %1789 = dma.done.wait (%p2265_p7), [#allocation12], 256  }
  0x83   : > { %1791 = vsyncadd (%p2266_p8), [#allocation12], 4294967040  ;;  %vm347_vm0 = vcmask 261120   ;;  %v2061_v0 = vld [vmem:[%s292_s16] sm:$0xff]  ;;  %v2063_v1 = vld [vmem:[%s292_s16 + $0x8] sm:$0xff]  ;;  %v1822_v15 = vmov 0.0   ;;  %v375_v23 = vlaneseq }
  0x84   : > { %v348_v2 = vsel %vm347_vm0, %v2061_v0, 0.0  ;;  %v351_v3 = vsel %vm347_vm0, %v2063_v1, 0.0  ;;  %v1545_v14 = vld [vmem:[#allocation7 + $0x8] sm:$0xff]   ;;  %1349 = vmatprep.subr.bf16.mxu0 %v1822_v15  ;;  %vm1823_vm1 = vmmov 0   ;;  %v1546_v16 = vld [vmem:[#allocation7] sm:$0xff]   ;;  %1357 = vmatprep.subr.bf16.mxu1 %v1822_v15  ;;  %v2084_v26 = vld [vmem:[#allocation5] sm:$0xff] }
  0x85   : > { %349 = vadd.xlane.f32.xlu0 %v348_v2  ;;  %1353 = vmatprep.mubr.msk.bf16.mxu0 %vm1823_vm1, %v1822_v15  ;;  %v2081_v24 = vshrl.u32 %v375_v23, 7  ;;  %s1824_s28 = smov 120   ;;  %s1825_s25 = smov 104   ;;  %vm463_vm2 = vcmask 64512   ;;  %vm710_vm3 = vcmask 1043456   ;;  %vm921_vm4 = vcmask 130048  }
  0x86   : > { %1350 = vmatpush3.bf16.msra.mxu0 %v1545_v14  ;;  %1359 = vmatprep.mubr.msk.bf16.mxu1 %vm1823_vm1, %v1822_v15  ;;  %s1826_s9 = smov 112   ;;  %s1827_s13 = smov 8  }
  0x87   : > { %1351 = vmatprep.subr.bf16.mxu0 %v1822_v15  ;;  %v377_v25 = vsub.s32 0, %v2081_v24  ;;  %v383_v30 = vsub.s32 1, %v2081_v24  ;;  %s1321_s14 = sshll.u32 %s1886_s27, 8  ;;  %s340_s17 = scalar_lea.vmem [#allocation13], %s1289_s30 }
  0x88   : > { %s1156_s11 = sshll.u32 %s340_s17, 4  ;;  %s2193_s7 = scalar_lea.hbm %s2247_s6, %s1321_s14  ;;  %s2196_s11 = int_to_ptr.vmem [resolvable:$true] %s1156_s11 }
  0x89   : > { %352 = vadd.xlane.f32.xlu0 %v351_v3  ;;  %v378_v29 = vrot.slane %v2084_v26, %v377_v25  ;;  %v384_v34 = vrot.slane %v2084_v26, %v383_v30  ;;  %s1143_s27 = scalar_lea.sflag [#allocation4], %s2039_s29  ;;  %s1734_s19 = scalar_lea.vmem %s2196_s11, 256 }
  0x8a   : > { %1352 = vmatpush3.bf16.msra.mxu0 %v1546_v16  ;;  %p1735_p11 = scmp.ne.s32.totalorder %s2196_s11, %s1734_s19  ;;  %p2267_p10 = scmp.ne.s32.totalorder %s2256_s15, 0 }
  0x8b   : > { %1363 = vmatprep.subr.bf16.mxu0 %v1822_v15  ;;  %s1828_s30 = smov [#allocation13]  }
  0x8c   : > { %p1736_p0 = pnand %p1735_p11, %p2267_p10  ;;  %s1738_s8 = sshll.u32 %s1828_s30, 4  ;;  %s1739_s8 = int_to_ptr.vmem [resolvable:$false] %s1738_s8 }
  0x8d   : > { %s1740_s16 = scalar_lea.vmem %s1739_s8, 512  ;;  %p1741_p5 = scmp.lt.s32.totalorder %s2196_s11, %s1739_s8 }
  0x8e   : > { %p1737_p13 = pneg %p1736_p0  ;;  %p1742_p9 = scmp.lt.s32.totalorder %s1740_s16, %s1734_s19 }
  0x90   : > { %p1743_p1 = por %p1742_p9, %p1741_p5 }
  0x92   : > { %p1744_p3 = pnand %p1743_p1, %p1737_p13 }
 0x10e   : > { %v350_v4 = vpop.xlane.xlu0 %349 }
 0x10f   : > { %v355_v5 = vmul.f32 0.03125, %v350_v4 }
 0x111   : > { %v357_v6 = vsub.f32 %v2061_v0, %v355_v5 }
 0x112   : > { %v353_v7 = vpop.xlane.xlu0 %352 }
 0x113   : > { %v356_v8 = vmul.f32 0.03125, %v353_v7  ;;  %v359_v9 = vmul.f32 %v357_v6, %v357_v6 }
 0x115   : > { %v358_v10 = vsub.f32 %v2063_v1, %v356_v8  ;;  %v361_v11 = vsel %vm347_vm0, %v359_v9, 0.0 }
 0x116   : > { %362 = vadd.xlane.f32.xlu1 %v361_v11 }
 0x117   : > { %v360_v12 = vmul.f32 %v358_v10, %v358_v10 }
 0x119   : > { %v364_v13 = vsel %vm347_vm0, %v360_v12, 0.0 }
 0x11a   : > { %365 = vadd.xlane.f32.xlu1 %v364_v13 }
 0x19f   : > { %v363_v17 = vpop.xlane.xlu1 %362 }
 0x1a0   : > { %v367_v18 = vmul.f32 0.03125, %v363_v17 }
 0x1a2   : > { %v369_v19 = vadd.f32 1e-05, %v367_v18 }
 0x1a3   : > { %v366_v20 = vpop.xlane.xlu1 %365 }
 0x1a4   : > { %1552 = vrsqrt.f32 %v369_v19  ;;  %v368_v21 = vmul.f32 0.03125, %v366_v20 }
 0x1a6   : > { %v370_v22 = vadd.f32 1e-05, %v368_v21 }
 0x1a8   : > { %1554 = vrsqrt.f32 %v370_v22 }
 0x1b1   : > { %v1553_v27 = vpop.eup %1552 }
 0x1b2   : > { %v373_v28 = vmul.f32 %v1553_v27, %v357_v6 }
 0x1b4   : > { %v379_v33 = vmul.f32 %v378_v29, %v373_v28 }
 0x1b5   : > { %v1555_v31 = vpop.eup %1554 }
 0x1b6   : > { %v374_v32 = vmul.f32 %v1555_v31, %v358_v10  ;;  %v385_v36 = vadd.f32 %v384_v34, %v379_v33 }
 0x1b8   : > { %v380_v35 = vmul.f32 %v378_v29, %v374_v32 }
 0x1ba   : > { %v386_v37 = vadd.f32 %v384_v34, %v380_v35 }
 0x1bc   : > { %v387_v38 = vpack.c.bf16 %v386_v37, %v385_v36 }
 0x1be   : > { %1354 = vmatmul.mubr.msk.bf16.vlgmr.msra.gmra.mxu0 %vm347_vm0, %v387_v38 }
 0x1bf   : > { %1365 = vmatprep.mubr.msk.bf16.mxu0 %vm1823_vm1, %v1822_v15 }
 0x27e   : > { %v441_v39 = vpop.f32.mrf.mxu0 }
 0x27f   : > { %v456_v40 = vpack.c.bf16 %v441_v39, %v441_v39 }
 0x280   : > { %v1355_v41 = vpop.f32.mrf.mxu0 }
 0x281   : > { %461 = vrot.lane.b32.xlu1 %v456_v40, %s1824_s28 }
 0x282   : > { %v444_v42 = vpop.f32.mrf.mxu0 }
 0x283   : > { %v1535_v43 = vpack.i.bf16 %v444_v42, %v441_v39  ;;  %v2092_v44 = vpack.c.bf16 %v444_v42, %v444_v42 }
 0x284   : > { %v1356_v45 = vpop.f32.mrf.mxu0 }
 0x285   : > { %1536 = vrot.lane.b32.xlu0 %v1535_v43, %s1825_s25  ;;  %511 = vrot.lane.b32.xlu1 %v2092_v44, %s1824_s28 }
 0x2f3   : > { %v462_v46 = vpop.permute.xlu1 %461 }
 0x2f4   : > { %v468_v47 = vsel %vm463_vm2, %v462_v46, 0 }
 0x2f5   : > { %1358 = vmatpush3.bf16.xpose.msra.mxu1 %v468_v47 }
 0x2f6   : > { %1369 = vmatprep.subr.bf16.mxu1 %v1822_v15 }
 0x2f7   : > { %v1537_v48 = vpop.permute.xlu0 %1536  ;;  %v512_v49 = vpop.permute.xlu1 %511 }
 0x2f8   : > { %v1539_v50 = vunpack.i.h.bf16 %v1537_v48  ;;  %v1538_v51 = vunpack.i.l.bf16 %v1537_v48  ;;  %v517_v52 = vsel %vm463_vm2, %v512_v49, 0 }
 0x2f9   : > { %1364 = vmatpush3.bf16.xpose.msra.mxu0 %v517_v52 }
 0x2fa   : > { %v2098_v53 = vpack.c.bf16 %v1539_v50, %v1539_v50  ;;  %v2100_v54 = vpack.c.bf16 %v1538_v51, %v1538_v51  ;;  %1375 = vmatprep.subr.bf16.mxu0 %v1822_v15 }
 0x2fc   : > { %1360 = vmatmul.mubr.msk.bf16.vlgmr.msra.gmra.mxu1 %vm463_vm2, %v456_v40  ;;  %609 = vrot.lane.b32.xlu0 %v2098_v53, %s1824_s28 }
 0x2fd   : > { %560 = vrot.lane.b32.xlu1 %v2100_v54, %s1824_s28  ;;  %1371 = vmatprep.mubr.msk.bf16.mxu1 %vm1823_vm1, %v1822_v15 }
 0x300   : > { %1366 = vmatmul.mubr.msk.bf16.vlgmr.msra.gmra.mxu0 %vm463_vm2, %v2092_v44 }
 0x301   : > { %1377 = vmatprep.mubr.msk.bf16.mxu0 %vm1823_vm1, %v1822_v15 }
 0x36e   : > { %v610_v55 = vpop.permute.xlu0 %609 }
 0x36f   : > { %v615_v56 = vsel %vm463_vm2, %v610_v55, 0  ;;  %v561_v57 = vpop.permute.xlu1 %560 }
 0x370   : > { %v566_v58 = vsel %vm463_vm2, %v561_v57, 0  ;;  %1376 = vmatpush3.bf16.xpose.msra.mxu0 %v615_v56 }
 0x371   : > { %1370 = vmatpush3.bf16.xpose.msra.mxu1 %v566_v58  ;;  %1387 = vmatprep.subr.bf16.mxu0 %v1822_v15 }
 0x372   : > { %1381 = vmatprep.subr.bf16.mxu1 %v1822_v15 }
 0x377   : > { %1378 = vmatmul.mubr.msk.bf16.vlgmr.msra.gmra.mxu0 %vm463_vm2, %v2098_v53 }
 0x378   : > { %1372 = vmatmul.mubr.msk.bf16.vlgmr.msra.gmra.mxu1 %vm463_vm2, %v2100_v54  ;;  %1389 = vmatprep.mubr.msk.bf16.mxu0 %vm1823_vm1, %v1822_v15 }
 0x379   : > { %1383 = vmatprep.mubr.msk.bf16.mxu1 %vm1823_vm1, %v1822_v15 }
 0x3bc   : > { %v504_v59 = vpop.f32.mrf.mxu1 }
 0x3bd   : > { %v657_v60 = vsel %vm463_vm2, %v504_v59, -inf }
 0x3be   : > { %v1361_v61 = vpop.f32.mrf.mxu1  ;;  %658 = vmax.xlane.f32.xlu1 %v657_v60 }
 0x3c0   : > { %v507_v62 = vpop.f32.mrf.mxu1  ;;  %v553_v63 = vpop.f32.mrf.mxu0 }
 0x3c1   : > { %v660_v2 = vsel %vm463_vm2, %v553_v63, -inf }
 0x3c2   : > { %v1362_v3 = vpop.f32.mrf.mxu1  ;;  %661 = vmax.xlane.f32.xlu0 %v660_v2  ;;  %v1367_v4 = vpop.f32.mrf.mxu0 }
 0x3c4   : > { %v556_v5 = vpop.f32.mrf.mxu0 }
 0x3c6   : > { %v1368_v6 = vpop.f32.mrf.mxu0 }
 0x3cf   : > { %705 = vrot.lane.b32.xlu1 %v456_v40, %s1826_s9 }
 0x437   : > { %v651_v7 = vpop.f32.mrf.mxu0 }
 0x438   : > { %v602_v8 = vpop.f32.mrf.mxu1  ;;  %v666_v14 = vsel %vm463_vm2, %v651_v7, -inf }
 0x439   : > { %v663_v9 = vsel %vm463_vm2, %v602_v8, -inf  ;;  %v1379_v10 = vpop.f32.mrf.mxu0 }
 0x43a   : > { %v1373_v11 = vpop.f32.mrf.mxu1  ;;  %664 = vmax.xlane.f32.xlu0 %v663_v9 }
 0x43b   : > { %v654_v12 = vpop.f32.mrf.mxu0 }
 0x43c   : > { %v605_v13 = vpop.f32.mrf.mxu1 }
 0x43d   : > { %v1380_v16 = vpop.f32.mrf.mxu0 }
 0x43e   : > { %v1374_v17 = vpop.f32.mrf.mxu1  ;;  %667 = vmax.xlane.f32.xlu0 %v666_v14 }
 0x447   : > { %v659_v18 = vpop.xlane.xlu1 %658 }
 0x448   : > { %v669_v19 = vsub.f32 %v504_v59, %v659_v18 }
 0x44a   : > { %v673_v20 = vmul.f32 1.442695, %v669_v19 }
 0x44b   : > { %v706_v21 = vpop.permute.xlu1 %705  ;;  %v662_v22 = vpop.xlane.xlu0 %661 }
 0x44c   : > { %1556 = vpow2.f32 %v673_v20  ;;  %v712_v23 = vsel %vm710_vm3, %v706_v21, 0  ;;  %v670_v25 = vsub.f32 %v553_v63, %v662_v22 }
 0x44d   : > { %1382 = vmatpush3.bf16.msra.mxu1 %v712_v23 }
 0x44e   : > { %v675_v27 = vmul.f32 1.442695, %v670_v25  ;;  %1393 = vmatprep.subr.bf16.mxu1 %v1822_v15 }
 0x450   : > { %1558 = vpow2.f32 %v675_v27 }
 0x459   : > { %v1557_v28 = vpop.eup %1556 }
 0x45a   : > { %v681_v29 = vsel %vm463_vm2, %v1557_v28, 0.0 }
 0x45b   : > { %682 = vadd.xlane.f32.xlu1 %v681_v29  ;;  %v913_v29 = vsub.s32 4, %v2081_v24 }
 0x45d   : > { %v1559_v30 = vpop.eup %1558 }
 0x45e   : > { %v684_v31 = vsel %vm463_vm2, %v1559_v30, 0.0 }
 0x45f   : > { %685 = vadd.xlane.f32.xlu0 %v684_v31 }
 0x4c3   : > { %v665_v32 = vpop.xlane.xlu0 %664 }
 0x4c4   : > { %v671_v33 = vsub.f32 %v602_v8, %v665_v32 }
 0x4c6   : > { %v677_v34 = vmul.f32 1.442695, %v671_v33 }
 0x4c7   : > { %v668_v35 = vpop.xlane.xlu0 %667 }
 0x4c8   : > { %1560 = vpow2.f32 %v677_v34  ;;  %v672_v36 = vsub.f32 %v651_v7, %v668_v35  ;;  %v1547_v7 = vld [vmem:[#allocation8] sm:$0xff]  }
 0x4ca   : > { %v679_v37 = vmul.f32 1.442695, %v672_v36 }
 0x4cc   : > { %1562 = vpow2.f32 %v679_v37 }
 0x4d5   : > { %v1561_v38 = vpop.eup %1560 }
 0x4d6   : > { %v687_v39 = vsel %vm463_vm2, %v1561_v38, 0.0 }
 0x4d7   : > { %688 = vadd.xlane.f32.xlu1 %v687_v39 }
 0x4d9   : > { %v1563_v40 = vpop.eup %1562 }
 0x4da   : > { %v690_v41 = vsel %vm463_vm2, %v1563_v40, 0.0 }
 0x4db   : > { %691 = vadd.xlane.f32.xlu0 %v690_v41 }
 0x4e4   : > { %v683_v42 = vpop.xlane.xlu1 %682 }
 0x4e5   : > { %1564 = vrcp.f32 %v683_v42 }
 0x4e8   : > { %802 = vrot.lane.b32.xlu1 %v2100_v54, %s1826_s9  ;;  %v686_v47 = vpop.xlane.xlu0 %685 }
 0x4e9   : > { %1566 = vrcp.f32 %v686_v47 }
 0x4ec   : > { %850 = vrot.lane.b32.xlu1 %v2098_v53, %s1826_s9 }
 0x4f1   : > { %754 = vrot.lane.b32.xlu0 %v2092_v44, %s1826_s9 }
 0x4f2   : > { %v1565_v43 = vpop.eup %1564 }
 0x4f3   : > { %v694_v45 = vmul.f32 %v1565_v43, %v1557_v28 }
 0x4f5   : > { %v701_v46 = vpack.c.bf16 %v694_v45, %v694_v45 }
 0x4f6   : > { %v1567_v49 = vpop.eup %1566 }
 0x4f7   : > { %1384 = vmatmul.mubr.msk.bf16.vlgmr.msra.gmra.mxu1 %vm463_vm2, %v701_v46  ;;  %v696_v44 = vmul.f32 %v1567_v49, %v1559_v30  ;;  %v914_v30 = vrot.slane %v2084_v26, %v913_v29 }
 0x4f8   : > { %1395 = vmatprep.mubr.msk.bf16.mxu1 %vm1823_vm1, %v1822_v15 }
 0x4f9   : > { %v702_v56 = vpack.c.bf16 %v696_v44, %v696_v44  ;;  %v1549_v44 = vld [vmem:[#allocation10] sm:$0xff]  }
 0x560   : > { %v689_v48 = vpop.xlane.xlu1 %688 }
 0x561   : > { %1568 = vrcp.f32 %v689_v48 }
 0x564   : > { %v803_v50 = vpop.permute.xlu1 %802  ;;  %v692_v51 = vpop.xlane.xlu0 %691 }
 0x565   : > { %v808_v52 = vsel %vm710_vm3, %v803_v50, 0  ;;  %1570 = vrcp.f32 %v692_v51 }
 0x566   : > { %1394 = vmatpush3.bf16.msra.mxu1 %v808_v52  ;;  %v1548_v52 = vld [vmem:[#allocation10 + $0x8] sm:$0xff]  }
 0x567   : > { %1405 = vmatprep.subr.bf16.mxu1 %v1822_v15 }
 0x568   : > { %v755_v53 = vpop.permute.xlu0 %754  ;;  %v851_v55 = vpop.permute.xlu1 %850 }
 0x569   : > { %v760_v54 = vsel %vm710_vm3, %v755_v53, 0  ;;  %v856_v57 = vsel %vm710_vm3, %v851_v55, 0 }
 0x56a   : > { %1388 = vmatpush3.bf16.msra.mxu0 %v760_v54 }
 0x56b   : > { %1399 = vmatprep.subr.bf16.mxu0 %v1822_v15 }
 0x56d   : > { %1390 = vmatmul.mubr.msk.bf16.vlgmr.msra.gmra.mxu0 %vm463_vm2, %v702_v56 }
 0x56e   : > { %v1569_v58 = vpop.eup %1568  ;;  %1400 = vmatpush3.bf16.msra.mxu0 %v856_v57  ;;  %1401 = vmatprep.mubr.msk.bf16.mxu0 %vm1823_vm1, %v1822_v15 }
 0x56f   : > { %v698_v59 = vmul.f32 %v1569_v58, %v1561_v38  ;;  %1411 = vmatprep.subr.bf16.mxu0 %v1822_v15 }
 0x571   : > { %v703_v60 = vpack.c.bf16 %v698_v59, %v698_v59  ;;  %v996_v59 = vsub.s32 2, %v2081_v24 }
 0x572   : > { %v1571_v61 = vpop.eup %1570 }
 0x573   : > { %1396 = vmatmul.mubr.msk.bf16.vlgmr.msra.gmra.mxu1 %vm463_vm2, %v703_v60  ;;  %v700_v62 = vmul.f32 %v1571_v61, %v1563_v40 }
 0x574   : > { %1407 = vmatprep.mubr.msk.bf16.mxu1 %vm1823_vm1, %v1822_v15  ;;  %1406 = vmatpush3.bf16.msra.mxu1 %v1547_v7 }
 0x575   : > { %v704_v63 = vpack.c.bf16 %v700_v62, %v700_v62  ;;  %1419 = vmatprep.subr.bf16.mxu1 %v1822_v15  ;;  %v997_v62 = vrot.slane %v2084_v26, %v996_v59 }
 0x577   : > { %1402 = vmatmul.mubr.msk.bf16.vlgmr.msra.gmra.mxu0 %vm463_vm2, %v704_v63  ;;  %v1002_v63 = vsub.s32 3, %v2081_v24 }
 0x578   : > { %1415 = vmatprep.mubr.msk.bf16.mxu0 %vm1823_vm1, %v1822_v15  ;;  %1412 = vmatpush3.bf16.msra.mxu0 %v1548_v52 }
 0x579   : > { %1413 = vmatprep.subr.bf16.mxu0 %v1822_v15 }
 0x57c   : > { %1414 = vmatpush3.bf16.msra.mxu0 %v1549_v44 }
 0x5b7   : > { %v748_v2 = vpop.f32.mrf.mxu1 }
 0x5b9   : > { %v1385_v3 = vpop.f32.mrf.mxu1 }
 0x5bb   : > { %v751_v4 = vpop.f32.mrf.mxu1 }
 0x5bd   : > { %v1386_v5 = vpop.f32.mrf.mxu1 }
 0x5be   : > { %v1003_v5 = vrot.slane %v2084_v26, %v1002_v63 }
 0x62d   : > { %v796_v6 = vpop.f32.mrf.mxu0 }
 0x62f   : > { %v1391_v8 = vpop.f32.mrf.mxu0 }
 0x631   : > { %v799_v9 = vpop.f32.mrf.mxu0 }
 0x633   : > { %v1392_v10 = vpop.f32.mrf.mxu0  ;;  %v844_v11 = vpop.f32.mrf.mxu1 }
 0x634   : > { %v1550_v10 = vld [vmem:[#allocation11 + $0x8] sm:$0xff]  }
 0x635   : > { %v1397_v12 = vpop.f32.mrf.mxu1 }
 0x636   : > { %v1013_v12 = vsub.s32 5, %v2081_v24 }
 0x637   : > { %v847_v13 = vpop.f32.mrf.mxu1  ;;  %v892_v14 = vpop.f32.mrf.mxu0 }
 0x638   : > { %v1540_v16 = vpack.i.bf16 %v892_v14, %v844_v11  ;;  %v1551_v11 = vld [vmem:[#allocation11] sm:$0xff]   ;;  %v1014_v13 = vrot.slane %v2084_v26, %v1013_v12 }
 0x639   : > { %v1398_v17 = vpop.f32.mrf.mxu1  ;;  %v1403_v18 = vpop.f32.mrf.mxu0 }
 0x63a   : > { %1541 = vrot.lane.b32.xlu1 %v1540_v16, %s1827_s13 }
 0x63b   : > { %v895_v19 = vpop.f32.mrf.mxu0 }
 0x63d   : > { %v1404_v20 = vpop.f32.mrf.mxu0 }
 0x6ac   : > { %v1542_v21 = vpop.permute.xlu1 %1541 }
 0x6ad   : > { %v1544_v22 = vunpack.i.h.bf16 %v1542_v21  ;;  %v1543_v23 = vunpack.i.l.bf16 %v1542_v21 }
 0x6af   : > { %v907_v25 = vsel %vm463_vm2, %v796_v6, %v1544_v22  ;;  %v906_v27 = vsel %vm463_vm2, %v748_v2, %v1543_v23 }
 0x6b0   : > { %v908_v28 = vpack.c.bf16 %v907_v25, %v906_v27 }
 0x6b2   : > { %1408 = vmatmul.mubr.msk.bf16.vlgmr.msra.gmra.mxu1 %vm921_vm4, %v908_v28 }
 0x6b3   : > { %1423 = vmatprep.mubr.msk.bf16.mxu1 %vm1823_vm1, %v1822_v15  ;;  %1420 = vmatpush3.bf16.msra.mxu1 %v1550_v10 }
 0x6b4   : > { %1421 = vmatprep.subr.bf16.mxu1 %v1822_v15  ;;  %v1080_v15 = vsub.s32 6, %v2081_v24 }
 0x6b6   : > { %v1081_v25 = vrot.slane %v2084_v26, %v1080_v15 }
 0x6b7   : > { %1422 = vmatpush3.bf16.msra.mxu1 %v1551_v11 }
 0x772   : > { %v959_v31 = vpop.f32.mrf.mxu1 }
 0x773   : > { %v960_v32 = vadd.f32 %v959_v31, %v914_v30 }
 0x774   : > { %v1409_v33 = vpop.f32.mrf.mxu1 }
 0x775   : > { %v966_v34 = vadd.f32 %v960_v32, %v2061_v0 }
 0x776   : > { %v962_v35 = vpop.f32.mrf.mxu1 }
 0x777   : > { %v963_v36 = vadd.f32 %v962_v35, %v914_v30  ;;  %v968_v37 = vsel %vm347_vm0, %v966_v34, 0.0 }
 0x778   : > { %969 = vadd.xlane.f32.xlu0 %v968_v37  ;;  %v1410_v38 = vpop.f32.mrf.mxu1 }
 0x779   : > { %v967_v39 = vadd.f32 %v963_v36, %v2063_v1 }
 0x77b   : > { %v971_v40 = vsel %vm347_vm0, %v967_v39, 0.0 }
 0x77c   : > { %972 = vadd.xlane.f32.xlu1 %v971_v40 }
 0x801   : > { %v970_v41 = vpop.xlane.xlu0 %969 }
 0x802   : > { %v974_v42 = vmul.f32 0.03125, %v970_v41 }
 0x804   : > { %v976_v43 = vsub.f32 %v966_v34, %v974_v42 }
 0x805   : > { %v973_v45 = vpop.xlane.xlu1 %972 }
 0x806   : > { %v975_v46 = vmul.f32 0.03125, %v973_v45  ;;  %v978_v47 = vmul.f32 %v976_v43, %v976_v43 }
 0x808   : > { %v977_v48 = vsub.f32 %v967_v39, %v975_v46  ;;  %v980_v49 = vsel %vm347_vm0, %v978_v47, 0.0 }
 0x809   : > { %981 = vadd.xlane.f32.xlu0 %v980_v49 }
 0x80a   : > { %v979_v50 = vmul.f32 %v977_v48, %v977_v48 }
 0x80c   : > { %v983_v51 = vsel %vm347_vm0, %v979_v50, 0.0 }
 0x80d   : > { %984 = vadd.xlane.f32.xlu0 %v983_v51 }
 0x892   : > { %v982_v53 = vpop.xlane.xlu0 %981 }
 0x893   : > { %v986_v54 = vmul.f32 0.03125, %v982_v53 }
 0x895   : > { %v988_v55 = vadd.f32 1e-05, %v986_v54 }
 0x896   : > { %v985_v56 = vpop.xlane.xlu0 %984 }
 0x897   : > { %1572 = vrsqrt.f32 %v988_v55  ;;  %v987_v57 = vmul.f32 0.03125, %v985_v56 }
 0x899   : > { %v989_v58 = vadd.f32 1e-05, %v987_v57 }
 0x89b   : > { %1574 = vrsqrt.f32 %v989_v58 }
 0x8a4   : > { %v1573_v60 = vpop.eup %1572 }
 0x8a5   : > { %v992_v61 = vmul.f32 %v1573_v60, %v976_v43 }
 0x8a7   : > { %v998_v4 = vmul.f32 %v997_v62, %v992_v61 }
 0x8a8   : > { %v1575_v2 = vpop.eup %1574 }
 0x8a9   : > { %v993_v3 = vmul.f32 %v1575_v2, %v977_v48  ;;  %v1004_v7 = vadd.f32 %v1003_v5, %v998_v4 }
 0x8ab   : > { %v999_v6 = vmul.f32 %v997_v62, %v993_v3 }
 0x8ad   : > { %v1005_v8 = vadd.f32 %v1003_v5, %v999_v6 }
 0x8af   : > { %v1006_v9 = vpack.c.bf16 %v1005_v8, %v1004_v7 }
 0x8b1   : > { %1416 = vmatmul.mubr.msk.bf16.vlgmr.msra.gmra.mxu0 %vm347_vm0, %v1006_v9 }
 0x971   : > { %v1064_v14 = vpop.f32.mrf.mxu0 }
 0x972   : > { %v1065_v17 = vadd.f32 %v1064_v14, %v1014_v13 }
 0x973   : > { %v1417_v16 = vpop.f32.mrf.mxu0 }
 0x974   : > { %v1071_v21 = vmax.f32 %v1065_v17, 0.0 }
 0x975   : > { %v1067_v18 = vpop.f32.mrf.mxu0 }
 0x976   : > { %v1068_v19 = vadd.f32 %v1067_v18, %v1014_v13 }
 0x977   : > { %v1418_v20 = vpop.f32.mrf.mxu0 }
 0x978   : > { %v1072_v22 = vmax.f32 %v1068_v19, 0.0 }
 0x97a   : > { %v1073_v23 = vpack.c.bf16 %v1072_v22, %v1071_v21 }
 0x97c   : > { %1424 = vmatmul.mubr.msk.bf16.vlgmr.msra.gmra.mxu1 %vm347_vm0, %v1073_v23 }
 0xa3c   : > { %v1131_v27 = vpop.f32.mrf.mxu1 }
 0xa3d   : > { %v1132_v28 = vadd.f32 %v1131_v27, %v1081_v25 }
 0xa3e   : > { %v1425_v29 = vpop.f32.mrf.mxu1 }
 0xa3f   : > { %v1138_v30 = vadd.f32 %v1132_v28, %v2061_v0 }
 0xa40   : > { %v1134_v31 = vpop.f32.mrf.mxu1 }
 0xa41   : > { %1140 = vst.msk [vmem:[%s340_s17] sm:$0xff] %vm347_vm0, %v1138_v30  ;;  %v1135_v32 = vadd.f32 %v1134_v31, %v1081_v25 }
 0xa42   : > { %v1426_v33 = vpop.f32.mrf.mxu1 }
 0xa43   : > { %v1139_v24 = vadd.f32 %v1135_v32, %v2063_v1 }
 0xa45   : > { %1141 = vst.msk [vmem:[%s340_s17 + $0x8] sm:$0xff] %vm347_vm0, %v1139_v24 }
 0xa46   : > { %1747 = shalt.err (!%p1744_p3)
}
 0xa47   : > { %s1748_s28 = scalar_lea.hbm %s2193_s7, 256  ;;  %s1752_s14 = scalar_lea.hbm %s2247_s6, 512 }
 0xa48   : > { %p1749_p4 = scmp.ne.s32.totalorder %s2193_s7, %s1748_s28  ;;  %p1753_p2 = scmp.lt.s32.totalorder %s2193_s7, %s2247_s6 }
 0xa49   : > { %p1754_p7 = scmp.lt.s32.totalorder %s1752_s14, %s1748_s28 }
 0xa4a   : > { %p1750_p12 = pnand %p1749_p4, %p2267_p10 }
 0xa4b   : > { %p1755_p8 = por %p1754_p7, %p1753_p2 }
 0xa4c   : > { %p1751_p6 = pneg %p1750_p12 }
 0xa4e   : > { %p1756_p11 = pnand %p1755_p8, %p1751_p6 }
 0xa50   : > { %1759 = shalt.err (!%p1756_p11)
}
 0xa51   : > { %s1829_s18 = smov 128  }
 0xa52   : > { %1449 = dma.vmem_to_hbm [thread:$0]  (%p2267_p10), %s2196_s11, 256, %s2193_s7, %s1143_s27, %s1829_s18, %s1829_s18, %s1827_s13  }
 0xa53 PF: > { %s1171_s19 = sand.u32 1, %s1798_s21   ;;  %p2268_p0 = scmp.ne.s32.totalorder %s2257_s26, 0 }
 0xa54   : > { %p2269_p13 = scmp.ge.s32.totalorder %s1810_s24, 2  ;;  %s1172_s30 = scalar_lea.sflag [#allocation4], %s1171_s19 }
 0xa56   : > { %p1472_p5 = pnand %p2269_p13, %p2268_p0 }
 0xa58   : > { %p1473_p9 = pneg %p1472_p5 }
 0xa5a   : > { %1793 = dma.done.wait (%p1473_p9), %s1172_s30, 256  }
 0xa5b   : > { %1795 = vsyncadd (%p1473_p9), %s1172_s30, 4294967040  ;;  %p22_p1 = scmp.ge.s32.totalorder %s1973_s10, 4   ;;  %s2270_s21 = smov %s1802_s22 }
 0xa5c   : > { %s2271_s22 = smov %s1806_s23  ;;  %s2272_s23 = smov %s1985_s20 }
 0xa5d   : > { %s2273_s24 = smov %s1973_s10  ;;  %24 = sbr.rel (!%p22_p1) target bundleno = 8 (0x8), region = 109 }
 0xa62   :  { %1177 = vsyncpa [#allocation3], 1 }
 0xa63   :  { %1179 = vsyncpa [#allocation3 + $0x1], 1 }
 0xa64   :  { %1180 = vsyncpa [#allocation6], 1 }
 0xa65   :  { %1181 = vsyncpa [#allocation9], 1 }
 0xa66   :  { %1182 = vsyncpa [#allocation12], 1 }
 0xa67   :  { %1183 = vsyncpa [#allocation4], 1 }
 0xa68   :  { %1185 = vsyncpa [#allocation4 + $0x1], 1 }

// kernel: tpu_custom_call.1
= control target key start
LH: loop header
LB: loop body
LE: loop exit
PB: predicated region body
PF: predicated region fallthrough
CT: control target
= control target key end

     0   :  { %11 = vsyncpa [#allocation3], 0  ;;  %s2241_s0 = inlined_call_operand.hbm [shape: f32[4,8,32], index: 0, kind: input, shape index: {}]   ;;  %s2242_s1 = inlined_call_operand.hbm [shape: f32[8,32], index: 1, kind: input, shape index: {}]   ;;  %s2243_s2 = inlined_call_operand.hbm [shape: bf16[32,48], index: 2, kind: input, shape index: {}]   ;;  %s2244_s3 = inlined_call_operand.hbm [shape: bf16[16,32], index: 3, kind: input, shape index: {}]   ;;  %s2245_s4 = inlined_call_operand.hbm [shape: bf16[32,32], index: 4, kind: input, shape index: {}]   ;;  %s2246_s5 = inlined_call_operand.hbm [shape: bf16[32,32], index: 5, kind: input, shape index: {}]   ;;  %s2247_s6 = inlined_call_operand.hbm [shape: f32[4,8,32], index: 6, kind: output, shape index: {}]  }
   0x1   :  { %13 = vsyncpa [#allocation3 + $0x1], 0 }
   0x2   :  { %14 = vsyncpa [#allocation6], 0 }
   0x3   :  { %15 = vsyncpa [#allocation9], 0 }
   0x4   :  { %16 = vsyncpa [#allocation12], 0 }
   0x5   :  { %17 = vsyncpa [#allocation4], 0 }
   0x6   :  { %19 = vsyncpa [#allocation4 + $0x1], 0  ;;  %s1865_s21 = smov 0   ;;  %s1867_s22 = smov 0  }
   0x7   :  { %s1869_s23 = smov 0   ;;  %s1871_s24 = smov 0  }
   0x8 LB: > { %s1812_s25 = smov [#allocation5]   ;;  %s1886_s27 = sadd.s32 4294967295, %s1810_s24   ;;  %s1810_s24 = sphi %s1871_s24, %s2273_s24   ;;  %s1806_s23 = sphi %s1869_s23, %s2272_s23   ;;  %s1802_s22 = sphi %s1867_s22, %s2271_s22   ;;  %s1798_s21 = sphi %s1865_s21, %s2270_s21  }
   0x9   : > { %s200_s26 = sshll.u32 %s1812_s25, 4  ;;  %p1278_p0 = scmp.ge.s32.totalorder %s1810_s24, 1  ;;  %s201_s26 = int_to_ptr.vmem [resolvable:$true] %s200_s26 }
   0xa   : > { %p2248_p1 = scmp.eq.s32.totalorder %s1886_s27, 0  ;;  %p187_p2 = scmp.lt.s32.totalorder %s1810_s24, 3 }
   0xb   : > { %s1813_s29 = smov [#allocation8]   ;;  %s1814_s8 = smov [#allocation7]  }
   0xc   : > { %p1891_p3 = pnand %p1278_p0, %p187_p2  ;;  %s223_s30 = sshll.u32 %s1813_s29, 4  ;;  %s1904_s30 = int_to_ptr.vmem [resolvable:$true] %s223_s30 }
   0xd   : > { %s210_s9 = sshll.u32 %s1814_s8, 4  ;;  %s1587_s11 = scalar_lea.vmem %s201_s26, 128  ;;  %s1906_s9 = int_to_ptr.vmem [resolvable:$true] %s210_s9 }
   0xe   : > { %s2252_s28 = scalar_select %p1891_p3, 1, 0 }
   0xf   : > { %p1451_p5 = pneg %p1891_p3  ;;  %p1588_p8 = scmp.ne.s32.totalorder %s201_s26, %s1587_s11 }
  0x10   : > { %p1595_p11 = scmp.lt.s32.totalorder %s201_s26, %s201_s26  ;;  %p1596_p12 = scmp.lt.s32.totalorder %s1587_s11, %s1587_s11 }
  0x11   : > { %p1900_p6 = pnand %p1451_p5, %p2248_p1 }
  0x12   : > { %p1597_p13 = por %p1596_p12, %p1595_p11 }
  0x13   : > { %p1910_p7 = pneg %p1900_p6 }
  0x15   : > { %p1590_p9 = pnand %p1588_p8, %p1910_p7 }
  0x17   : > { %p1591_p10 = pneg %p1590_p9 }
  0x19   : > { %p1598_p0 = pnand %p1597_p13, %p1591_p10 }
  0x1b   : > { %1601 = shalt.err (!%p1598_p0)
}
  0x1c   : > { %1454 = dma.hbm_to_vmem [thread:$0]  (!%p1900_p6), %s2242_s1, 128, %s201_s26, [#allocation6]  }
  0x1d   : > { %s1613_s14 = scalar_lea.vmem %s1904_s30, 128  ;;  %p1621_p9 = scmp.lt.s32.totalorder %s1904_s30, %s1904_s30 }
  0x1e   : > { %p1614_p2 = scmp.ne.s32.totalorder %s1904_s30, %s1613_s14  ;;  %p1622_p11 = scmp.lt.s32.totalorder %s1613_s14, %s1613_s14 }
  0x20   : > { %p1616_p5 = pnand %p1614_p2, %p1910_p7  ;;  %p1623_p10 = por %p1622_p11, %p1621_p9 }
  0x22   : > { %p1617_p8 = pneg %p1616_p5 }
  0x24   : > { %p1624_p12 = pnand %p1623_p10, %p1617_p8 }
  0x26   : > { %1627 = shalt.err (!%p1624_p12)
}
  0x27   : > { %s1815_s15 = smov 64   ;;  %s1816_s16 = smov 4  }
  0x28   : > { %1460 = dma.hbm_to_vmem [thread:$0]  (!%p1900_p6), %s2244_s3, 128, %s1904_s30, [#allocation9], %s1815_s15, %s1815_s15, %s1816_s16  }
  0x29   : > { %s1639_s19 = scalar_lea.vmem %s1906_s9, 256  ;;  %p1647_p5 = scmp.lt.s32.totalorder %s1906_s9, %s1906_s9 }
  0x2a   : > { %p1640_p13 = scmp.ne.s32.totalorder %s1906_s9, %s1639_s19  ;;  %p1648_p8 = scmp.lt.s32.totalorder %s1639_s19, %s1639_s19 }
  0x2c   : > { %p1642_p0 = pnand %p1640_p13, %p1910_p7  ;;  %p1649_p9 = por %p1648_p8, %p1647_p5 }
  0x2e   : > { %p1643_p2 = pneg %p1642_p0 }
  0x30   : > { %p1650_p11 = pnand %p1649_p9, %p1643_p2 }
  0x32   : > { %1653 = shalt.err (!%p1650_p11)
}
  0x33   : > { %1457 = dma.hbm_to_vmem [thread:$0]  (!%p1900_p6), %s2243_s2, 256, %s1906_s9, [#allocation6], %s1815_s15, %s1815_s15, %s1816_s16  }
  0x34   : > { %s1817_s26 = smov [#allocation10]   ;;  %s1818_s30 = smov [#allocation11]  }
  0x35   : > { %s236_s29 = sshll.u32 %s1817_s26, 4  ;;  %s249_s8 = sshll.u32 %s1818_s30, 4  ;;  %s237_s29 = int_to_ptr.vmem [resolvable:$true] %s236_s29  ;;  %s250_s8 = int_to_ptr.vmem [resolvable:$true] %s249_s8 }
  0x36   : > { %s1665_s11 = scalar_lea.vmem %s237_s29, 256  ;;  %p1673_p0 = scmp.lt.s32.totalorder %s237_s29, %s237_s29 }
  0x37   : > { %p1666_p10 = scmp.ne.s32.totalorder %s237_s29, %s1665_s11  ;;  %p1674_p2 = scmp.lt.s32.totalorder %s1665_s11, %s1665_s11 }
  0x39   : > { %p1668_p12 = pnand %p1666_p10, %p1910_p7  ;;  %p1675_p5 = por %p1674_p2, %p1673_p0 }
  0x3b   : > { %p1669_p13 = pneg %p1668_p12 }
  0x3d   : > { %p1676_p8 = pnand %p1675_p5, %p1669_p13 }
  0x3f   : > { %1679 = shalt.err (!%p1676_p8)
}
  0x40   : > { %1463 = dma.hbm_to_vmem [thread:$0]  (!%p1900_p6), %s2245_s4, 256, %s237_s29, [#allocation9], %s1815_s15, %s1815_s15, %s1816_s16  }
  0x41   : > { %s1691_s13 = scalar_lea.vmem %s250_s8, 256  ;;  %p1699_p12 = scmp.lt.s32.totalorder %s250_s8, %s250_s8 }
  0x42   : > { %p1692_p9 = scmp.ne.s32.totalorder %s250_s8, %s1691_s13  ;;  %p1700_p0 = scmp.lt.s32.totalorder %s1691_s13, %s1691_s13 }
  0x44   : > { %p1694_p11 = pnand %p1692_p9, %p1910_p7  ;;  %p1701_p13 = por %p1700_p0, %p1699_p12 }
  0x46   : > { %p1695_p10 = pneg %p1694_p11 }
  0x48   : > { %p1702_p2 = pnand %p1701_p13, %p1695_p10 }
  0x4a   : > { %1705 = shalt.err (!%p1702_p2)
}
  0x4b   : > { %1466 = dma.hbm_to_vmem [thread:$0]  (!%p1900_p6), %s2246_s5, 256, %s250_s8, [#allocation12], %s1815_s15, %s1815_s15, %s1816_s16  }
  0x4c   : > { %s1277_s7 = sadd.s32 4294967294, %s1810_s24   ;;  %s1973_s10 = sadd.s32 1, %s1810_s24  }
  0x4d   : > { %s32_s18 = sadd.s32 1, %s1806_s23  ;;  %s29_s19 = ssub.s32 %s1810_s24, %s1973_s10 }
  0x4e   : > { %p39_p7 = scmp.ne.s32.totalorder %s1806_s23, %s1802_s22  ;;  %p30_p5 = scmp.eq.s32.totalorder %s29_s19, 0 }
  0x4f   : > { %p40_p8 = scmp.eq.s32.totalorder %s1810_s24, 0  ;;  %p45_p9 = scmp.ne.s32.totalorder %s1802_s22, %s1798_s21 }
  0x50   : > { %p174_p11 = scmp.eq.s32.totalorder %s1886_s27, 1  ;;  %p180_p0 = scmp.eq.s32.totalorder %s1277_s7, 1 }
  0x51   : > { %s1985_s20 = scalar_select %p30_p5, %s1806_s23, %s32_s18  }
  0x52   : > { %p41_p10 = por %p40_p8, %p39_p7  ;;  %p1989_p12 = por %p2248_p1, %p45_p9 }
  0x53   : > { %p1993_p6 = por %p174_p11, %p39_p7  ;;  %p1480_p13 = scmp.lt.s32.totalorder %s1810_s24, 2 }
  0x54   : > { %s2255_s25 = scalar_select %p1989_p12, 1, 0 }
  0x55   : > { %s2256_s15 = scalar_select %p1993_p6, 1, 0 }
  0x56   : > { %s263_s16 = sand.u32 1, %s1806_s23   ;;  %p1999_p2 = por %p180_p0, %p45_p9 }
  0x57   : > { %s1285_s29 = sshll.u32 %s263_s16, 4  ;;  %s1320_s30 = sshll.u32 %s1810_s24, 8 }
  0x58   : > { %s2257_s26 = scalar_select %p1999_p2, 1, 0 }
  0x59   : > { %s2007_s9 = scalar_lea.hbm %s2241_s0, %s1320_s30  ;;  %s267_s12 = scalar_lea.vmem [#allocation2], %s1285_s29 }
  0x5a   : > { %s274_s13 = sshll.u32 %s267_s12, 4  ;;  %p2009_p7 = pnand %p1480_p13, %p41_p10  ;;  %s2013_s13 = int_to_ptr.vmem [resolvable:$true] %s274_s13 }
  0x5b   : > { %s2015_s17 = scalar_lea.sflag [#allocation3], %s263_s16  ;;  %s1706_s7 = scalar_lea.hbm %s2007_s9, 256 }
  0x5c   : > { %p1707_p5 = scmp.ne.s32.totalorder %s2007_s9, %s1706_s7  ;;  %p1708_p8 = pneg %p2009_p7 }
  0x5d   : > { %s1711_s29 = scalar_lea.hbm %s2241_s0, 512  ;;  %p1712_p10 = scmp.lt.s32.totalorder %s2007_s9, %s2241_s0 }
  0x5e   : > { %p1709_p9 = pnand %p1708_p8, %p1707_p5  ;;  %p1713_p0 = scmp.lt.s32.totalorder %s1711_s29, %s1706_s7 }
  0x60   : > { %p1710_p11 = pneg %p1709_p9  ;;  %p1714_p13 = por %p1713_p0, %p1712_p10 }
  0x62   : > { %p1715_p4 = pnand %p1714_p13, %p1710_p11 }
  0x64   : > { %1718 = shalt.err (!%p1715_p4)
}
  0x65   : > { %s1719_s16 = scalar_lea.vmem %s2013_s13, 256  ;;  %s1819_s11 = smov [#allocation2]  }
  0x66   : > { %p1720_p1 = scmp.ne.s32.totalorder %s2013_s13, %s1719_s16  ;;  %s1724_s12 = sshll.u32 %s1819_s11, 4  ;;  %s1725_s12 = int_to_ptr.vmem [resolvable:$false] %s1724_s12 }
  0x67   : > { %s1726_s18 = scalar_lea.vmem %s1725_s12, 512  ;;  %p1727_p9 = scmp.lt.s32.totalorder %s2013_s13, %s1725_s12 }
  0x68   : > { %p1722_p2 = pnand %p1720_p1, %p1708_p8  ;;  %p1728_p6 = scmp.lt.s32.totalorder %s1726_s18, %s1719_s16 }
  0x6a   : > { %p1723_p5 = pneg %p1722_p2  ;;  %p1729_p12 = por %p1728_p6, %p1727_p9 }
  0x6c   : > { %p1730_p3 = pnand %p1729_p12, %p1723_p5 }
  0x6e   : > { %1733 = shalt.err (!%p1730_p3)
}
  0x6f   : > { %s1820_s7 = smov 128   ;;  %s1821_s19 = smov 8  }
  0x70   : > { %1470 = dma.hbm_to_vmem [thread:$0]  (!%p2009_p7), %s2007_s9, 256, %s2013_s13, %s2015_s17, %s1820_s7, %s1820_s7, %s1821_s19  }
  0x71   : > { %p2259_p1 = scmp.ne.s32.totalorder %s2252_s28, 0 }
  0x72   : > { %s2039_s29 = sand.u32 (!%p2259_p1), 1, %s1802_s22   ;;  %p2260_p3 = scmp.ne.s32.totalorder (!%p2259_p1), %s2255_s25, 0 }
  0x73   : > { %286 = sbr.rel (%p2259_p1) target bundleno = 2643 (0xa53), region = 44  ;;  %s1289_s30 = sshll.u32 (!%p2259_p1), %s2039_s29, 4 }
  0x74   : > { %s289_s8 = scalar_lea.sflag (!%p2259_p1), [#allocation3], %s2039_s29  ;;  %s292_s16 = scalar_lea.vmem (!%p2259_p1), [#allocation2], %s1289_s30 }
  0x78   : > { %1777 = dma.done.wait (%p2260_p3), %s289_s8, 256  }
  0x79   : > { %1779 = vsyncadd (%p2260_p3), %s289_s8, 4294967040  ;;  %p2261_p4 = scmp.eq.s32.totalorder %s1886_s27, 0 }
  0x7b   : > { %1781 = dma.done.wait (%p2261_p4), [#allocation6], 384   ;;  %p2262_p12 = pmov %p2261_p4 }
  0x7c   : > { %p2263_p6 = pmov %p2261_p4 }
  0x7d   : > { %1783 = vsyncadd (%p2262_p12), [#allocation6], 4294966912 }
  0x7e   : > { %1785 = dma.done.wait (%p2263_p6), [#allocation9], 384   ;;  %p2264_p2 = pmov %p2261_p4 }
  0x80   : > { %1787 = vsyncadd (%p2264_p2), [#allocation9], 4294966912  ;;  %p2265_p7 = pmov %p2264_p2 }
  0x81   : > { %p2266_p8 = pmov %p2264_p2 }
  0x82   : > { %1789 = dma.done.wait (%p2265_p7), [#allocation12], 256  }
  0x83   : > { %1791 = vsyncadd (%p2266_p8), [#allocation12], 4294967040  ;;  %vm347_vm0 = vcmask 261120   ;;  %v2061_v0 = vld [vmem:[%s292_s16] sm:$0xff]  ;;  %v2063_v1 = vld [vmem:[%s292_s16 + $0x8] sm:$0xff]  ;;  %v1822_v15 = vmov 0.0   ;;  %v375_v23 = vlaneseq }
  0x84   : > { %v348_v2 = vsel %vm347_vm0, %v2061_v0, 0.0  ;;  %v351_v3 = vsel %vm347_vm0, %v2063_v1, 0.0  ;;  %v1545_v14 = vld [vmem:[#allocation7 + $0x8] sm:$0xff]   ;;  %1349 = vmatprep.subr.bf16.mxu0 %v1822_v15  ;;  %vm1823_vm1 = vmmov 0   ;;  %v1546_v16 = vld [vmem:[#allocation7] sm:$0xff]   ;;  %1357 = vmatprep.subr.bf16.mxu1 %v1822_v15  ;;  %v2084_v26 = vld [vmem:[#allocation5] sm:$0xff] }
  0x85   : > { %349 = vadd.xlane.f32.xlu0 %v348_v2  ;;  %1353 = vmatprep.mubr.msk.bf16.mxu0 %vm1823_vm1, %v1822_v15  ;;  %v2081_v24 = vshrl.u32 %v375_v23, 7  ;;  %s1824_s28 = smov 120   ;;  %s1825_s25 = smov 104   ;;  %vm463_vm2 = vcmask 64512   ;;  %vm710_vm3 = vcmask 1043456   ;;  %vm921_vm4 = vcmask 130048  }
  0x86   : > { %1350 = vmatpush3.bf16.msra.mxu0 %v1545_v14  ;;  %1359 = vmatprep.mubr.msk.bf16.mxu1 %vm1823_vm1, %v1822_v15  ;;  %s1826_s9 = smov 112   ;;  %s1827_s13 = smov 8  }
  0x87   : > { %1351 = vmatprep.subr.bf16.mxu0 %v1822_v15  ;;  %v377_v25 = vsub.s32 0, %v2081_v24  ;;  %v383_v30 = vsub.s32 1, %v2081_v24  ;;  %s1321_s14 = sshll.u32 %s1886_s27, 8  ;;  %s340_s17 = scalar_lea.vmem [#allocation13], %s1289_s30 }
  0x88   : > { %s1156_s11 = sshll.u32 %s340_s17, 4  ;;  %s2193_s7 = scalar_lea.hbm %s2247_s6, %s1321_s14  ;;  %s2196_s11 = int_to_ptr.vmem [resolvable:$true] %s1156_s11 }
  0x89   : > { %352 = vadd.xlane.f32.xlu0 %v351_v3  ;;  %v378_v29 = vrot.slane %v2084_v26, %v377_v25  ;;  %v384_v34 = vrot.slane %v2084_v26, %v383_v30  ;;  %s1143_s27 = scalar_lea.sflag [#allocation4], %s2039_s29  ;;  %s1734_s19 = scalar_lea.vmem %s2196_s11, 256 }
  0x8a   : > { %1352 = vmatpush3.bf16.msra.mxu0 %v1546_v16  ;;  %p1735_p11 = scmp.ne.s32.totalorder %s2196_s11, %s1734_s19  ;;  %p2267_p10 = scmp.ne.s32.totalorder %s2256_s15, 0 }
  0x8b   : > { %1363 = vmatprep.subr.bf16.mxu0 %v1822_v15  ;;  %s1828_s30 = smov [#allocation13]  }
  0x8c   : > { %p1736_p0 = pnand %p1735_p11, %p2267_p10  ;;  %s1738_s8 = sshll.u32 %s1828_s30, 4  ;;  %s1739_s8 = int_to_ptr.vmem [resolvable:$false] %s1738_s8 }
  0x8d   : > { %s1740_s16 = scalar_lea.vmem %s1739_s8, 512  ;;  %p1741_p5 = scmp.lt.s32.totalorder %s2196_s11, %s1739_s8 }
  0x8e   : > { %p1737_p13 = pneg %p1736_p0  ;;  %p1742_p9 = scmp.lt.s32.totalorder %s1740_s16, %s1734_s19 }
  0x90   : > { %p1743_p1 = por %p1742_p9, %p1741_p5 }
  0x92   : > { %p1744_p3 = pnand %p1743_p1, %p1737_p13 }
 0x10e   : > { %v350_v4 = vpop.xlane.xlu0 %349 }
 0x10f   : > { %v355_v5 = vmul.f32 0.03125, %v350_v4 }
 0x111   : > { %v357_v6 = vsub.f32 %v2061_v0, %v355_v5 }
 0x112   : > { %v353_v7 = vpop.xlane.xlu0 %352 }
 0x113   : > { %v356_v8 = vmul.f32 0.03125, %v353_v7  ;;  %v359_v9 = vmul.f32 %v357_v6, %v357_v6 }
 0x115   : > { %v358_v10 = vsub.f32 %v2063_v1, %v356_v8  ;;  %v361_v11 = vsel %vm347_vm0, %v359_v9, 0.0 }
 0x116   : > { %362 = vadd.xlane.f32.xlu1 %v361_v11 }
 0x117   : > { %v360_v12 = vmul.f32 %v358_v10, %v358_v10 }
 0x119   : > { %v364_v13 = vsel %vm347_vm0, %v360_v12, 0.0 }
 0x11a   : > { %365 = vadd.xlane.f32.xlu1 %v364_v13 }
 0x19f   : > { %v363_v17 = vpop.xlane.xlu1 %362 }
 0x1a0   : > { %v367_v18 = vmul.f32 0.03125, %v363_v17 }
 0x1a2   : > { %v369_v19 = vadd.f32 1e-05, %v367_v18 }
 0x1a3   : > { %v366_v20 = vpop.xlane.xlu1 %365 }
 0x1a4   : > { %1552 = vrsqrt.f32 %v369_v19  ;;  %v368_v21 = vmul.f32 0.03125, %v366_v20 }
 0x1a6   : > { %v370_v22 = vadd.f32 1e-05, %v368_v21 }
 0x1a8   : > { %1554 = vrsqrt.f32 %v370_v22 }
 0x1b1   : > { %v1553_v27 = vpop.eup %1552 }
 0x1b2   : > { %v373_v28 = vmul.f32 %v1553_v27, %v357_v6 }
 0x1b4   : > { %v379_v33 = vmul.f32 %v378_v29, %v373_v28 }
 0x1b5   : > { %v1555_v31 = vpop.eup %1554 }
 0x1b6   : > { %v374_v32 = vmul.f32 %v1555_v31, %v358_v10  ;;  %v385_v36 = vadd.f32 %v384_v34, %v379_v33 }
 0x1b8   : > { %v380_v35 = vmul.f32 %v378_v29, %v374_v32 }
 0x1ba   : > { %v386_v37 = vadd.f32 %v384_v34, %v380_v35 }
 0x1bc   : > { %v387_v38 = vpack.c.bf16 %v386_v37, %v385_v36 }
 0x1be   : > { %1354 = vmatmul.mubr.msk.bf16.vlgmr.msra.gmra.mxu0 %vm347_vm0, %v387_v38 }
 0x1bf   : > { %1365 = vmatprep.mubr.msk.bf16.mxu0 %vm1823_vm1, %v1822_v15 }
 0x27e   : > { %v441_v39 = vpop.f32.mrf.mxu0 }
 0x27f   : > { %v456_v40 = vpack.c.bf16 %v441_v39, %v441_v39 }
 0x280   : > { %v1355_v41 = vpop.f32.mrf.mxu0 }
 0x281   : > { %461 = vrot.lane.b32.xlu1 %v456_v40, %s1824_s28 }
 0x282   : > { %v444_v42 = vpop.f32.mrf.mxu0 }
 0x283   : > { %v1535_v43 = vpack.i.bf16 %v444_v42, %v441_v39  ;;  %v2092_v44 = vpack.c.bf16 %v444_v42, %v444_v42 }
 0x284   : > { %v1356_v45 = vpop.f32.mrf.mxu0 }
 0x285   : > { %1536 = vrot.lane.b32.xlu0 %v1535_v43, %s1825_s25  ;;  %511 = vrot.lane.b32.xlu1 %v2092_v44, %s1824_s28 }
 0x2f3   : > { %v462_v46 = vpop.permute.xlu1 %461 }
 0x2f4   : > { %v468_v47 = vsel %vm463_vm2, %v462_v46, 0 }
 0x2f5   : > { %1358 = vmatpush3.bf16.xpose.msra.mxu1 %v468_v47 }
 0x2f6   : > { %1369 = vmatprep.subr.bf16.mxu1 %v1822_v15 }
 0x2f7   : > { %v1537_v48 = vpop.permute.xlu0 %1536  ;;  %v512_v49 = vpop.permute.xlu1 %511 }
 0x2f8   : > { %v1539_v50 = vunpack.i.h.bf16 %v1537_v48  ;;  %v1538_v51 = vunpack.i.l.bf16 %v1537_v48  ;;  %v517_v52 = vsel %vm463_vm2, %v512_v49, 0 }
 0x2f9   : > { %1364 = vmatpush3.bf16.xpose.msra.mxu0 %v517_v52 }
 0x2fa   : > { %v2098_v53 = vpack.c.bf16 %v1539_v50, %v1539_v50  ;;  %v2100_v54 = vpack.c.bf16 %v1538_v51, %v1538_v51  ;;  %1375 = vmatprep.subr.bf16.mxu0 %v1822_v15 }
 0x2fc   : > { %1360 = vmatmul.mubr.msk.bf16.vlgmr.msra.gmra.mxu1 %vm463_vm2, %v456_v40  ;;  %609 = vrot.lane.b32.xlu0 %v2098_v53, %s1824_s28 }
 0x2fd   : > { %560 = vrot.lane.b32.xlu1 %v2100_v54, %s1824_s28  ;;  %1371 = vmatprep.mubr.msk.bf16.mxu1 %vm1823_vm1, %v1822_v15 }
 0x300   : > { %1366 = vmatmul.mubr.msk.bf16.vlgmr.msra.gmra.mxu0 %vm463_vm2, %v2092_v44 }
 0x301   : > { %1377 = vmatprep.mubr.msk.bf16.mxu0 %vm1823_vm1, %v1822_v15 }
 0x36e   : > { %v610_v55 = vpop.permute.xlu0 %609 }
 0x36f   : > { %v615_v56 = vsel %vm463_vm2, %v610_v55, 0  ;;  %v561_v57 = vpop.permute.xlu1 %560 }
 0x370   : > { %v566_v58 = vsel %vm463_vm2, %v561_v57, 0  ;;  %1376 = vmatpush3.bf16.xpose.msra.mxu0 %v615_v56 }
 0x371   : > { %1370 = vmatpush3.bf16.xpose.msra.mxu1 %v566_v58  ;;  %1387 = vmatprep.subr.bf16.mxu0 %v1822_v15 }
 0x372   : > { %1381 = vmatprep.subr.bf16.mxu1 %v1822_v15 }
 0x377   : > { %1378 = vmatmul.mubr.msk.bf16.vlgmr.msra.gmra.mxu0 %vm463_vm2, %v2098_v53 }
 0x378   : > { %1372 = vmatmul.mubr.msk.bf16.vlgmr.msra.gmra.mxu1 %vm463_vm2, %v2100_v54  ;;  %1389 = vmatprep.mubr.msk.bf16.mxu0 %vm1823_vm1, %v1822_v15 }
 0x379   : > { %1383 = vmatprep.mubr.msk.bf16.mxu1 %vm1823_vm1, %v1822_v15 }
 0x3bc   : > { %v504_v59 = vpop.f32.mrf.mxu1 }
 0x3bd   : > { %v657_v60 = vsel %vm463_vm2, %v504_v59, -inf }
 0x3be   : > { %v1361_v61 = vpop.f32.mrf.mxu1  ;;  %658 = vmax.xlane.f32.xlu1 %v657_v60 }
 0x3c0   : > { %v507_v62 = vpop.f32.mrf.mxu1  ;;  %v553_v63 = vpop.f32.mrf.mxu0 }
 0x3c1   : > { %v660_v2 = vsel %vm463_vm2, %v553_v63, -inf }
 0x3c2   : > { %v1362_v3 = vpop.f32.mrf.mxu1  ;;  %661 = vmax.xlane.f32.xlu0 %v660_v2  ;;  %v1367_v4 = vpop.f32.mrf.mxu0 }
 0x3c4   : > { %v556_v5 = vpop.f32.mrf.mxu0 }
 0x3c6   : > { %v1368_v6 = vpop.f32.mrf.mxu0 }
 0x3cf   : > { %705 = vrot.lane.b32.xlu1 %v456_v40, %s1826_s9 }
 0x437   : > { %v651_v7 = vpop.f32.mrf.mxu0 }
 0x438   : > { %v602_v8 = vpop.f32.mrf.mxu1  ;;  %v666_v14 = vsel %vm463_vm2, %v651_v7, -inf }
 0x439   : > { %v663_v9 = vsel %vm463_vm2, %v602_v8, -inf  ;;  %v1379_v10 = vpop.f32.mrf.mxu0 }
 0x43a   : > { %v1373_v11 = vpop.f32.mrf.mxu1  ;;  %664 = vmax.xlane.f32.xlu0 %v663_v9 }
 0x43b   : > { %v654_v12 = vpop.f32.mrf.mxu0 }
 0x43c   : > { %v605_v13 = vpop.f32.mrf.mxu1 }
 0x43d   : > { %v1380_v16 = vpop.f32.mrf.mxu0 }
 0x43e   : > { %v1374_v17 = vpop.f32.mrf.mxu1  ;;  %667 = vmax.xlane.f32.xlu0 %v666_v14 }
 0x447   : > { %v659_v18 = vpop.xlane.xlu1 %658 }
 0x448   : > { %v669_v19 = vsub.f32 %v504_v59, %v659_v18 }
 0x44a   : > { %v673_v20 = vmul.f32 1.442695, %v669_v19 }
 0x44b   : > { %v706_v21 = vpop.permute.xlu1 %705  ;;  %v662_v22 = vpop.xlane.xlu0 %661 }
 0x44c   : > { %1556 = vpow2.f32 %v673_v20  ;;  %v712_v23 = vsel %vm710_vm3, %v706_v21, 0  ;;  %v670_v25 = vsub.f32 %v553_v63, %v662_v22 }
 0x44d   : > { %1382 = vmatpush3.bf16.msra.mxu1 %v712_v23 }
 0x44e   : > { %v675_v27 = vmul.f32 1.442695, %v670_v25  ;;  %1393 = vmatprep.subr.bf16.mxu1 %v1822_v15 }
 0x450   : > { %1558 = vpow2.f32 %v675_v27 }
 0x459   : > { %v1557_v28 = vpop.eup %1556 }
 0x45a   : > { %v681_v29 = vsel %vm463_vm2, %v1557_v28, 0.0 }
 0x45b   : > { %682 = vadd.xlane.f32.xlu1 %v681_v29  ;;  %v913_v29 = vsub.s32 4, %v2081_v24 }
 0x45d   : > { %v1559_v30 = vpop.eup %1558 }
 0x45e   : > { %v684_v31 = vsel %vm463_vm2, %v1559_v30, 0.0 }
 0x45f   : > { %685 = vadd.xlane.f32.xlu0 %v684_v31 }
 0x4c3   : > { %v665_v32 = vpop.xlane.xlu0 %664 }
 0x4c4   : > { %v671_v33 = vsub.f32 %v602_v8, %v665_v32 }
 0x4c6   : > { %v677_v34 = vmul.f32 1.442695, %v671_v33 }
 0x4c7   : > { %v668_v35 = vpop.xlane.xlu0 %667 }
 0x4c8   : > { %1560 = vpow2.f32 %v677_v34  ;;  %v672_v36 = vsub.f32 %v651_v7, %v668_v35  ;;  %v1547_v7 = vld [vmem:[#allocation8] sm:$0xff]  }
 0x4ca   : > { %v679_v37 = vmul.f32 1.442695, %v672_v36 }
 0x4cc   : > { %1562 = vpow2.f32 %v679_v37 }
 0x4d5   : > { %v1561_v38 = vpop.eup %1560 }
 0x4d6   : > { %v687_v39 = vsel %vm463_vm2, %v1561_v38, 0.0 }
 0x4d7   : > { %688 = vadd.xlane.f32.xlu1 %v687_v39 }
 0x4d9   : > { %v1563_v40 = vpop.eup %1562 }
 0x4da   : > { %v690_v41 = vsel %vm463_vm2, %v1563_v40, 0.0 }
 0x4db   : > { %691 = vadd.xlane.f32.xlu0 %v690_v41 }
 0x4e4   : > { %v683_v42 = vpop.xlane.xlu1 %682 }
 0x4e5   : > { %1564 = vrcp.f32 %v683_v42 }
 0x4e8   : > { %802 = vrot.lane.b32.xlu1 %v2100_v54, %s1826_s9  ;;  %v686_v47 = vpop.xlane.xlu0 %685 }
 0x4e9   : > { %1566 = vrcp.f32 %v686_v47 }
 0x4ec   : > { %850 = vrot.lane.b32.xlu1 %v2098_v53, %s1826_s9 }
 0x4f1   : > { %754 = vrot.lane.b32.xlu0 %v2092_v44, %s1826_s9 }
 0x4f2   : > { %v1565_v43 = vpop.eup %1564 }
 0x4f3   : > { %v694_v45 = vmul.f32 %v1565_v43, %v1557_v28 }
 0x4f5   : > { %v701_v46 = vpack.c.bf16 %v694_v45, %v694_v45 }
 0x4f6   : > { %v1567_v49 = vpop.eup %1566 }
 0x4f7   : > { %1384 = vmatmul.mubr.msk.bf16.vlgmr.msra.gmra.mxu1 %vm463_vm2, %v701_v46  ;;  %v696_v44 = vmul.f32 %v1567_v49, %v1559_v30  ;;  %v914_v30 = vrot.slane %v2084_v26, %v913_v29 }
 0x4f8   : > { %1395 = vmatprep.mubr.msk.bf16.mxu1 %vm1823_vm1, %v1822_v15 }
 0x4f9   : > { %v702_v56 = vpack.c.bf16 %v696_v44, %v696_v44  ;;  %v1549_v44 = vld [vmem:[#allocation10] sm:$0xff]  }
 0x560   : > { %v689_v48 = vpop.xlane.xlu1 %688 }
 0x561   : > { %1568 = vrcp.f32 %v689_v48 }
 0x564   : > { %v803_v50 = vpop.permute.xlu1 %802  ;;  %v692_v51 = vpop.xlane.xlu0 %691 }
 0x565   : > { %v808_v52 = vsel %vm710_vm3, %v803_v50, 0  ;;  %1570 = vrcp.f32 %v692_v51 }
 0x566   : > { %1394 = vmatpush3.bf16.msra.mxu1 %v808_v52  ;;  %v1548_v52 = vld [vmem:[#allocation10 + $0x8] sm:$0xff]  }
 0x567   : > { %1405 = vmatprep.subr.bf16.mxu1 %v1822_v15 }
 0x568   : > { %v755_v53 = vpop.permute.xlu0 %754  ;;  %v851_v55 = vpop.permute.xlu1 %850 }
 0x569   : > { %v760_v54 = vsel %vm710_vm3, %v755_v53, 0  ;;  %v856_v57 = vsel %vm710_vm3, %v851_v55, 0 }
 0x56a   : > { %1388 = vmatpush3.bf16.msra.mxu0 %v760_v54 }
 0x56b   : > { %1399 = vmatprep.subr.bf16.mxu0 %v1822_v15 }
 0x56d   : > { %1390 = vmatmul.mubr.msk.bf16.vlgmr.msra.gmra.mxu0 %vm463_vm2, %v702_v56 }
 0x56e   : > { %v1569_v58 = vpop.eup %1568  ;;  %1400 = vmatpush3.bf16.msra.mxu0 %v856_v57  ;;  %1401 = vmatprep.mubr.msk.bf16.mxu0 %vm1823_vm1, %v1822_v15 }
 0x56f   : > { %v698_v59 = vmul.f32 %v1569_v58, %v1561_v38  ;;  %1411 = vmatprep.subr.bf16.mxu0 %v1822_v15 }
 0x571   : > { %v703_v60 = vpack.c.bf16 %v698_v59, %v698_v59  ;;  %v996_v59 = vsub.s32 2, %v2081_v24 }
 0x572   : > { %v1571_v61 = vpop.eup %1570 }
 0x573   : > { %1396 = vmatmul.mubr.msk.bf16.vlgmr.msra.gmra.mxu1 %vm463_vm2, %v703_v60  ;;  %v700_v62 = vmul.f32 %v1571_v61, %v1563_v40 }
 0x574   : > { %1407 = vmatprep.mubr.msk.bf16.mxu1 %vm1823_vm1, %v1822_v15  ;;  %1406 = vmatpush3.bf16.msra.mxu1 %v1547_v7 }
 0x575   : > { %v704_v63 = vpack.c.bf16 %v700_v62, %v700_v62  ;;  %1419 = vmatprep.subr.bf16.mxu1 %v1822_v15  ;;  %v997_v62 = vrot.slane %v2084_v26, %v996_v59 }
 0x577   : > { %1402 = vmatmul.mubr.msk.bf16.vlgmr.msra.gmra.mxu0 %vm463_vm2, %v704_v63  ;;  %v1002_v63 = vsub.s32 3, %v2081_v24 }
 0x578   : > { %1415 = vmatprep.mubr.msk.bf16.mxu0 %vm1823_vm1, %v1822_v15  ;;  %1412 = vmatpush3.bf16.msra.mxu0 %v1548_v52 }
 0x579   : > { %1413 = vmatprep.subr.bf16.mxu0 %v1822_v15 }
 0x57c   : > { %1414 = vmatpush3.bf16.msra.mxu0 %v1549_v44 }
 0x5b7   : > { %v748_v2 = vpop.f32.mrf.mxu1 }
 0x5b9   : > { %v1385_v3 = vpop.f32.mrf.mxu1 }
 0x5bb   : > { %v751_v4 = vpop.f32.mrf.mxu1 }
 0x5bd   : > { %v1386_v5 = vpop.f32.mrf.mxu1 }
 0x5be   : > { %v1003_v5 = vrot.slane %v2084_v26, %v1002_v63 }
 0x62d   : > { %v796_v6 = vpop.f32.mrf.mxu0 }
 0x62f   : > { %v1391_v8 = vpop.f32.mrf.mxu0 }
 0x631   : > { %v799_v9 = vpop.f32.mrf.mxu0 }
 0x633   : > { %v1392_v10 = vpop.f32.mrf.mxu0  ;;  %v844_v11 = vpop.f32.mrf.mxu1 }
 0x634   : > { %v1550_v10 = vld [vmem:[#allocation11 + $0x8] sm:$0xff]  }
 0x635   : > { %v1397_v12 = vpop.f32.mrf.mxu1 }
 0x636   : > { %v1013_v12 = vsub.s32 5, %v2081_v24 }
 0x637   : > { %v847_v13 = vpop.f32.mrf.mxu1  ;;  %v892_v14 = vpop.f32.mrf.mxu0 }
 0x638   : > { %v1540_v16 = vpack.i.bf16 %v892_v14, %v844_v11  ;;  %v1551_v11 = vld [vmem:[#allocation11] sm:$0xff]   ;;  %v1014_v13 = vrot.slane %v2084_v26, %v1013_v12 }
 0x639   : > { %v1398_v17 = vpop.f32.mrf.mxu1  ;;  %v1403_v18 = vpop.f32.mrf.mxu0 }
 0x63a   : > { %1541 = vrot.lane.b32.xlu1 %v1540_v16, %s1827_s13 }
 0x63b   : > { %v895_v19 = vpop.f32.mrf.mxu0 }
 0x63d   : > { %v1404_v20 = vpop.f32.mrf.mxu0 }
 0x6ac   : > { %v1542_v21 = vpop.permute.xlu1 %1541 }
 0x6ad   : > { %v1544_v22 = vunpack.i.h.bf16 %v1542_v21  ;;  %v1543_v23 = vunpack.i.l.bf16 %v1542_v21 }
 0x6af   : > { %v907_v25 = vsel %vm463_vm2, %v796_v6, %v1544_v22  ;;  %v906_v27 = vsel %vm463_vm2, %v748_v2, %v1543_v23 }
 0x6b0   : > { %v908_v28 = vpack.c.bf16 %v907_v25, %v906_v27 }
 0x6b2   : > { %1408 = vmatmul.mubr.msk.bf16.vlgmr.msra.gmra.mxu1 %vm921_vm4, %v908_v28 }
 0x6b3   : > { %1423 = vmatprep.mubr.msk.bf16.mxu1 %vm1823_vm1, %v1822_v15  ;;  %1420 = vmatpush3.bf16.msra.mxu1 %v1550_v10 }
 0x6b4   : > { %1421 = vmatprep.subr.bf16.mxu1 %v1822_v15  ;;  %v1080_v15 = vsub.s32 6, %v2081_v24 }
 0x6b6   : > { %v1081_v25 = vrot.slane %v2084_v26, %v1080_v15 }
 0x6b7   : > { %1422 = vmatpush3.bf16.msra.mxu1 %v1551_v11 }
 0x772   : > { %v959_v31 = vpop.f32.mrf.mxu1 }
 0x773   : > { %v960_v32 = vadd.f32 %v959_v31, %v914_v30 }
 0x774   : > { %v1409_v33 = vpop.f32.mrf.mxu1 }
 0x775   : > { %v966_v34 = vadd.f32 %v960_v32, %v2061_v0 }
 0x776   : > { %v962_v35 = vpop.f32.mrf.mxu1 }
 0x777   : > { %v963_v36 = vadd.f32 %v962_v35, %v914_v30  ;;  %v968_v37 = vsel %vm347_vm0, %v966_v34, 0.0 }
 0x778   : > { %969 = vadd.xlane.f32.xlu0 %v968_v37  ;;  %v1410_v38 = vpop.f32.mrf.mxu1 }
 0x779   : > { %v967_v39 = vadd.f32 %v963_v36, %v2063_v1 }
 0x77b   : > { %v971_v40 = vsel %vm347_vm0, %v967_v39, 0.0 }
 0x77c   : > { %972 = vadd.xlane.f32.xlu1 %v971_v40 }
 0x801   : > { %v970_v41 = vpop.xlane.xlu0 %969 }
 0x802   : > { %v974_v42 = vmul.f32 0.03125, %v970_v41 }
 0x804   : > { %v976_v43 = vsub.f32 %v966_v34, %v974_v42 }
 0x805   : > { %v973_v45 = vpop.xlane.xlu1 %972 }
 0x806   : > { %v975_v46 = vmul.f32 0.03125, %v973_v45  ;;  %v978_v47 = vmul.f32 %v976_v43, %v976_v43 }
 0x808   : > { %v977_v48 = vsub.f32 %v967_v39, %v975_v46  ;;  %v980_v49 = vsel %vm347_vm0, %v978_v47, 0.0 }
 0x809   : > { %981 = vadd.xlane.f32.xlu0 %v980_v49 }
 0x80a   : > { %v979_v50 = vmul.f32 %v977_v48, %v977_v48 }
 0x80c   : > { %v983_v51 = vsel %vm347_vm0, %v979_v50, 0.0 }
 0x80d   : > { %984 = vadd.xlane.f32.xlu0 %v983_v51 }
 0x892   : > { %v982_v53 = vpop.xlane.xlu0 %981 }
 0x893   : > { %v986_v54 = vmul.f32 0.03125, %v982_v53 }
 0x895   : > { %v988_v55 = vadd.f32 1e-05, %v986_v54 }
 0x896   : > { %v985_v56 = vpop.xlane.xlu0 %984 }
 0x897   : > { %1572 = vrsqrt.f32 %v988_v55  ;;  %v987_v57 = vmul.f32 0.03125, %v985_v56 }
 0x899   : > { %v989_v58 = vadd.f32 1e-05, %v987_v57 }
 0x89b   : > { %1574 = vrsqrt.f32 %v989_v58 }
 0x8a4   : > { %v1573_v60 = vpop.eup %1572 }
 0x8a5   : > { %v992_v61 = vmul.f32 %v1573_v60, %v976_v43 }
 0x8a7   : > { %v998_v4 = vmul.f32 %v997_v62, %v992_v61 }
 0x8a8   : > { %v1575_v2 = vpop.eup %1574 }
 0x8a9   : > { %v993_v3 = vmul.f32 %v1575_v2, %v977_v48  ;;  %v1004_v7 = vadd.f32 %v1003_v5, %v998_v4 }
 0x8ab   : > { %v999_v6 = vmul.f32 %v997_v62, %v993_v3 }
 0x8ad   : > { %v1005_v8 = vadd.f32 %v1003_v5, %v999_v6 }
 0x8af   : > { %v1006_v9 = vpack.c.bf16 %v1005_v8, %v1004_v7 }
 0x8b1   : > { %1416 = vmatmul.mubr.msk.bf16.vlgmr.msra.gmra.mxu0 %vm347_vm0, %v1006_v9 }
 0x971   : > { %v1064_v14 = vpop.f32.mrf.mxu0 }
 0x972   : > { %v1065_v17 = vadd.f32 %v1064_v14, %v1014_v13 }
 0x973   : > { %v1417_v16 = vpop.f32.mrf.mxu0 }
 0x974   : > { %v1071_v21 = vmax.f32 %v1065_v17, 0.0 }
 0x975   : > { %v1067_v18 = vpop.f32.mrf.mxu0 }
 0x976   : > { %v1068_v19 = vadd.f32 %v1067_v18, %v1014_v13 }
 0x977   : > { %v1418_v20 = vpop.f32.mrf.mxu0 }
 0x978   : > { %v1072_v22 = vmax.f32 %v1068_v19, 0.0 }
 0x97a   : > { %v1073_v23 = vpack.c.bf16 %v1072_v22, %v1071_v21 }
 0x97c   : > { %1424 = vmatmul.mubr.msk.bf16.vlgmr.msra.gmra.mxu1 %vm347_vm0, %v1073_v23 }
 0xa3c   : > { %v1131_v27 = vpop.f32.mrf.mxu1 }
 0xa3d   : > { %v1132_v28 = vadd.f32 %v1131_v27, %v1081_v25 }
 0xa3e   : > { %v1425_v29 = vpop.f32.mrf.mxu1 }
 0xa3f   : > { %v1138_v30 = vadd.f32 %v1132_v28, %v2061_v0 }
 0xa40   : > { %v1134_v31 = vpop.f32.mrf.mxu1 }
 0xa41   : > { %1140 = vst.msk [vmem:[%s340_s17] sm:$0xff] %vm347_vm0, %v1138_v30  ;;  %v1135_v32 = vadd.f32 %v1134_v31, %v1081_v25 }
 0xa42   : > { %v1426_v33 = vpop.f32.mrf.mxu1 }
 0xa43   : > { %v1139_v24 = vadd.f32 %v1135_v32, %v2063_v1 }
 0xa45   : > { %1141 = vst.msk [vmem:[%s340_s17 + $0x8] sm:$0xff] %vm347_vm0, %v1139_v24 }
 0xa46   : > { %1747 = shalt.err (!%p1744_p3)
}
 0xa47   : > { %s1748_s28 = scalar_lea.hbm %s2193_s7, 256  ;;  %s1752_s14 = scalar_lea.hbm %s2247_s6, 512 }
 0xa48   : > { %p1749_p4 = scmp.ne.s32.totalorder %s2193_s7, %s1748_s28  ;;  %p1753_p2 = scmp.lt.s32.totalorder %s2193_s7, %s2247_s6 }
 0xa49   : > { %p1754_p7 = scmp.lt.s32.totalorder %s1752_s14, %s1748_s28 }
 0xa4a   : > { %p1750_p12 = pnand %p1749_p4, %p2267_p10 }
 0xa4b   : > { %p1755_p8 = por %p1754_p7, %p1753_p2 }
 0xa4c   : > { %p1751_p6 = pneg %p1750_p12 }
 0xa4e   : > { %p1756_p11 = pnand %p1755_p8, %p1751_p6 }
 0xa50   : > { %1759 = shalt.err (!%p1756_p11)
}
 0xa51   : > { %s1829_s18 = smov 128  }
 0xa52   : > { %1449 = dma.vmem_to_hbm [thread:$0]  (%p2267_p10), %s2196_s11, 256, %s2193_s7, %s1143_s27, %s1829_s18, %s1829_s18, %s1827_s13  }
 0xa53 PF: > { %s1171_s19 = sand.u32 1, %s1798_s21   ;;  %p2268_p0 = scmp.ne.s32.totalorder %s2257_s26, 0 }
 0xa54   : > { %p2269_p13 = scmp.ge.s32.totalorder %s1810_s24, 2  ;;  %s1172_s30 = scalar_lea.sflag [#allocation4], %s1171_s19 }
 0xa56   : > { %p1472_p5 = pnand %p2269_p13, %p2268_p0 }
 0xa58   : > { %p1473_p9 = pneg %p1472_p5 }
 0xa5a   : > { %1793 = dma.done.wait (%p1473_p9), %s1172_s30, 256  }
 0xa5b   : > { %1795 = vsyncadd (%p1473_p9), %s1172_s30, 4294967040  ;;  %p22_p1 = scmp.ge.s32.totalorder %s1973_s10, 4   ;;  %s2270_s21 = smov %s1802_s22 }
 0xa5c   : > { %s2271_s22 = smov %s1806_s23  ;;  %s2272_s23 = smov %s1985_s20 }
 0xa5d   : > { %s2273_s24 = smov %s1973_s10  ;;  %24 = sbr.rel (!%p22_p1) target bundleno = 8 (0x8), region = 109 }
 0xa62   :  { %1177 = vsyncpa [#allocation3], 1 }
 0xa63   :  { %1179 = vsyncpa [#allocation3 + $0x1], 1 }
 0xa64   :  { %1180 = vsyncpa [#allocation6], 1 }
 0xa65   :  { %1181 = vsyncpa [#allocation9], 1 }
 0xa66   :  { %1182 = vsyncpa [#allocation12], 1 }
 0xa67   :  { %1183 = vsyncpa [#allocation4], 1 }
 0xa68   :  { %1185 = vsyncpa [#allocation4 + $0x1], 1 }

</bundles_post_ra>
